<compile_context>
chip_gen: v7x
topology: tpu7x:2x2x1
jax: 0.10.0
libtpu: 0.0.40
codegen_flags: <defaults>
</compile_context>

<pallas_src>
import jax
import jax.numpy as jnp
from jax.experimental import pallas as pl
from jax.experimental.pallas import tpu as pltpu


# --------------------------------------------------------------------------- #
# Hardware / budget helpers (evaluated once, outside any trace).
# --------------------------------------------------------------------------- #
def _round_up(x, m):
    return ((x + m - 1) // m) * m


def _vmem_capacity_bytes():
    try:
        info = pltpu.get_tpu_info()
        cap = int(getattr(info, "vmem_capacity_bytes", 0) or 0)
        if cap > 0:
            return cap
    except Exception:
        pass
    return 64 * 1024 * 1024  # conservative default = v7x per-core VMEM


_VMEM_CAP = _vmem_capacity_bytes()
# ~62% of physical: leaves headroom for Mosaic internal scratch / temporaries.
# v7x (64 MiB) -> ~40 MiB usable; v5e/v6e (128 MiB) -> ~79 MiB usable.
_VMEM_BUDGET = max(int(_VMEM_CAP * 0.62), 24 * 1024 * 1024)


def _vmem_estimate(tm, tb, dp, out_bytes):
    """Rough bytes of VMEM the pipelined kernel needs for a (tm, tb) tiling."""
    d3 = 3 * dp
    return (2 * tb * tm * dp * 2            # x stream, bf16, double-buffered
            + 2 * tb * tm * dp * out_bytes  # out stream, double-buffered
            + 2 * dp * d3 * 2 * 2           # wi + wh const tiles (bf16), 2 bufs each
            + 2 * 8 * d3 * 4                # bx bias tile (sublane-padded)
            + 2 * 8 * dp * 4                # bhn bias tile
            + tm * dp * 4                   # hidden-state scratch
            + tb * tm * d3 * 4              # per-block gx scratch (f32)
            + 12 * tm * dp * 4)             # live gate-math values / spill headroom


def _choose_tiles(m, t, dp, out_bytes):
    """Pick (tm, TB, M_pad, T_pad) under the VMEM budget.

    tm is a multiple of 8; the parallel M axis gets >=2 blocks whenever
    M >= 16 so v7x's two TensorCores are both used (near-free on 1-TC chips).
    """
    m8 = _round_up(max(m, 8), 8)
    tm_cap = _round_up((m8 + 1) // 2, 8) if m8 >= 16 else m8
    tm_cap = min(tm_cap, 1024)

    tm = tm_cap
    while tm > 8 and _vmem_estimate(tm, 1, dp, out_bytes) > _VMEM_BUDGET:
        tm -= 8
    tm = max(tm, 8)

    tb = 1
    tb_cap = max(1, min(t, 16))   # cap the static unroll of the time loop
    while tb < tb_cap and _vmem_estimate(tm, tb + 1, dp, out_bytes) <= _VMEM_BUDGET:
        tb += 1

    m_pad = _round_up(m8, tm)
    t_pad = _round_up(t, tb)
    return tm, tb, m_pad, t_pad


# --------------------------------------------------------------------------- #
# Pallas kernel
# --------------------------------------------------------------------------- #
def gru_kernel(x_ref, wi_ref, wh_ref, bx_ref, bhn_ref, out_ref, h_ref, gx_ref):
    """One (m-tile, time-block) grid cell of the GRU recurrence.

    x_ref  : (TB, tm, Dp)   bf16  raw inputs for TB timesteps of this m-tile
    wi_ref : (Dp, 3Dp)      bf16  fused input weights  [Wir | Wiz | Win]^T (padded)
    wh_ref : (Dp, 3Dp)      bf16  fused hidden weights [Whr | Whz | Whn]^T (padded)
    bx_ref : (1, 3Dp)       f32   b_ih with b_hr/b_hz folded in (b_hn excluded)
    bhn_ref: (1, Dp)        f32   candidate-gate hidden bias (scaled by r)
    out_ref: (TB, tm, Dp)   f32
    h_ref  : (tm, Dp)       f32   VMEM scratch: hidden state, persists over t
    gx_ref : (TB, tm, 3Dp)  f32   VMEM scratch: hoisted input projections
    """
    # Correctness relies on: the time axis is the LAST (fastest-iterating,
    # "arbitrary") grid axis, and megacore sharding only splits the "parallel"
    # M axis with per-core scratch.  h_ref is re-zeroed whenever t == 0.
    t = pl.program_id(1)

    @pl.when(t == 0)
    def _():
        h_ref[...] = jnp.zeros_like(h_ref)

    tb_steps = x_ref.shape[0]
    tm = x_ref.shape[1]
    d = bhn_ref.shape[-1]

    # --- hoisted input projection: one big MXU matmul for all TB timesteps ---
    x2 = x_ref[...].reshape(tb_steps * tm, d)               # bf16 (tm % 8 == 0)
    gx_ref[...] = (jnp.dot(x2, wi_ref[...],
                           preferred_element_type=jnp.float32)
                   + bx_ref[...]).reshape(tb_steps, tm, 3 * d)

    wh = wh_ref[...]                                         # (Dp, 3Dp) bf16
    bhn = jnp.broadcast_to(bhn_ref[...], (tm, d))            # hoisted broadcast

    h = h_ref[...]                                           # (tm, Dp) f32
    for tb in range(tb_steps):                               # static unroll
        gx = gx_ref[tb]                                      # (tm, 3Dp) f32
        hh = jnp.dot(h.astype(jnp.bfloat16), wh,
                     preferred_element_type=jnp.float32)     # (tm, 3Dp) f32
        # sigmoid(x) = 0.5*tanh(0.5*x) + 0.5  (keeps transcendentals on the EUP)
        r = 0.5 * jnp.tanh(0.5 * (gx[:, :d] + hh[:, :d])) + 0.5
        z = 0.5 * jnp.tanh(0.5 * (gx[:, d:2 * d] + hh[:, d:2 * d])) + 0.5
        n = jnp.tanh(gx[:, 2 * d:] + r * (hh[:, 2 * d:] + bhn))
        h = n + z * (h - n)                                  # == (1-z)*n + z*h
        out_ref[tb] = h.astype(out_ref.dtype)
    h_ref[...] = h


# --------------------------------------------------------------------------- #
# Wrapper (single jitted program: transpose + padding + weight packing + kernel)
# --------------------------------------------------------------------------- #
@jax.jit
def gru_layer_forward(inputs, params):
    """inputs: (B, T, N, D) float32.  Returns (T, B*N, D) float32."""
    w_ih, w_hh, b_ih, b_hh = params
    B, T, N, D = inputs.shape
    M = B * N
    Dp = _round_up(D, 128)          # lane-dense gate slices & output stores

    out_bytes = 4                   # output stays f32 (module semantics)
    tm, TB, M_pad, T_pad = _choose_tiles(M, T, Dp, out_bytes)

    # (B, T, N, D) -> (T, B*N, D); row m = b*N + n matches the PyTorch
    # inputs.transpose(1, 2).reshape(B*N, T, D) ordering.
    x = jnp.transpose(inputs, (1, 0, 2, 3)).reshape(T, M, D)
    x = jnp.pad(x, ((0, T_pad - T), (0, M_pad - M), (0, Dp - D)))
    x = x.astype(jnp.bfloat16)

    # Pack weights gate-blocked into padded (Dp, 3Dp) layout (zero padding
    # keeps padded lanes of h exactly zero through the recurrence).
    def pack_w(w):
        w3 = jnp.zeros((3, Dp, Dp), jnp.float32).at[:, :D, :D].set(
            w.reshape(3, D, D))                        # [gate, out, in]
        return jnp.transpose(w3, (2, 0, 1)).reshape(Dp, 3 * Dp).astype(jnp.bfloat16)

    wi = pack_w(w_ih)
    wh = pack_w(w_hh)

    b_i3 = b_ih.reshape(3, D)
    b_h3 = b_hh.reshape(3, D)
    bx3 = b_i3.at[:2].add(b_h3[:2])   # fold b_hr, b_hz; b_hn stays separate (scaled by r)
    bx = jnp.zeros((3, Dp), jnp.float32).at[:, :D].set(bx3).reshape(1, 3 * Dp)
    bhn = jnp.zeros((1, Dp), jnp.float32).at[0, :D].set(b_h3[2])

    est = _vmem_estimate(tm, TB, Dp, out_bytes)
    vmem_limit = int(min(max(est * 1.4, 32 * 1024 * 1024), _VMEM_CAP * 0.9))

    out = pl.pallas_call(
        gru_kernel,
        out_shape=jax.ShapeDtypeStruct((T_pad, M_pad, Dp), jnp.float32),
        grid_spec=pltpu.PrefetchScalarGridSpec(
            num_scalar_prefetch=0,
            # M axis parallel (megacore-shardable); time axis is the serial
            # recurrence and MUST be the innermost (fastest) grid axis.
            grid=(M_pad // tm, T_pad // TB),
            in_specs=[
                pl.BlockSpec((TB, tm, Dp), lambda m, t: (t, m, 0)),
                pl.BlockSpec((Dp, 3 * Dp), lambda m, t: (0, 0)),
                pl.BlockSpec((Dp, 3 * Dp), lambda m, t: (0, 0)),
                pl.BlockSpec((1, 3 * Dp), lambda m, t: (0, 0)),
                pl.BlockSpec((1, Dp), lambda m, t: (0, 0)),
            ],
            out_specs=pl.BlockSpec((TB, tm, Dp), lambda m, t: (t, m, 0)),
            scratch_shapes=[
                pltpu.VMEM((tm, Dp), jnp.float32),           # hidden state
                pltpu.VMEM((TB, tm, 3 * Dp), jnp.float32),   # hoisted gx slab
            ],
        ),
        compiler_params=pltpu.CompilerParams(
            dimension_semantics=("parallel", "arbitrary"),
            vmem_limit_bytes=vmem_limit,
        ),
    )(x, wi, wh, bx, bhn)

    return out[:T, :M, :D]


# --------------------------------------------------------------------------- #
# Params + pure-JAX reference (torch.nn.GRUCell semantics)
# --------------------------------------------------------------------------- #
def init_params(key, d_model):
    """PyTorch nn.GRUCell-style params: uniform(-1/sqrt(H), 1/sqrt(H)).

    Returns (weight_ih (3D, D), weight_hh (3D, D), bias_ih (3D,), bias_hh (3D,))
    with PyTorch gate order [r, z, n] along the leading axis.
    """
    bound = float(d_model) ** -0.5
    k = jax.random.split(key, 4)
    w_ih = jax.random.uniform(k[0], (3 * d_model, d_model), jnp.float32, -bound, bound)
    w_hh = jax.random.uniform(k[1], (3 * d_model, d_model), jnp.float32, -bound, bound)
    b_ih = jax.random.uniform(k[2], (3 * d_model,), jnp.float32, -bound, bound)
    b_hh = jax.random.uniform(k[3], (3 * d_model,), jnp.float32, -bound, bound)
    return w_ih, w_hh, b_ih, b_hh


def gru_reference(inputs, params):
    """Pure-JAX f32 reference matching the PyTorch module's forward."""
    w_ih, w_hh, b_ih, b_hh = params
    B, T, N, D = inputs.shape
    M = B * N
    x = jnp.transpose(inputs, (1, 0, 2, 3)).reshape(T, M, D)

    def step(h, xt):
        gi = xt @ w_ih.T + b_ih
        gh = h @ w_hh.T + b_hh
        i_r, i_z, i_n = gi[:, :D], gi[:, D:2 * D], gi[:, 2 * D:]
        h_r, h_z, h_n = gh[:, :D], gh[:, D:2 * D], gh[:, 2 * D:]
        r = jax.nn.sigmoid(i_r + h_r)
        z = jax.nn.sigmoid(i_z + h_z)
        n = jnp.tanh(i_n + r * h_n)
        h_new = (1.0 - z) * n + z * h
        return h_new, h_new

    h0 = jnp.zeros((M, D), jnp.float32)
    _, ys = jax.lax.scan(step, h0, x)
    return ys  # (T, M, D)


if __name__ == "__main__":
    batch, seq_len, num_nodes, d_model = 2, 8, 4, 32

    key = jax.random.PRNGKey(0)
    k_in, k_par = jax.random.split(key)
    inputs = jax.random.normal(k_in, (batch, seq_len, num_nodes, d_model),
                               dtype=jnp.float32)
    params = init_params(k_par, d_model)

    out = jax.block_until_ready(gru_layer_forward(inputs, params))
    ref = jax.block_until_ready(gru_reference(inputs, params))

    assert out.shape == (seq_len, batch * num_nodes, d_model)
    # bf16 MXU operands with f32 accumulation; sigmoid/tanh-bounded outputs keep
    # rounding well under this tolerance at T=8.
    err = float(jnp.max(jnp.abs(out - ref)))
    assert err < 5e-2, f"max abs err {err}"

    print("KERNEL_OK")
</pallas_src>

<mosaic_0001>
module attributes {stable_mosaic.version = 11 : i64} {
  func.func @gru_kernel(%arg0: i32, %arg1: i32, %arg2: memref<8x8x128xbf16, #tpu.memory_space<vmem>>, %arg3: memref<128x384xbf16, #tpu.memory_space<vmem>>, %arg4: memref<128x384xbf16, #tpu.memory_space<vmem>>, %arg5: memref<1x384xf32, #tpu.memory_space<vmem>>, %arg6: memref<1x128xf32, #tpu.memory_space<vmem>>, %arg7: memref<8x8x128xf32, #tpu.memory_space<vmem>>, %arg8: memref<8x128xf32, #tpu.memory_space<vmem>>, %arg9: memref<8x8x384xf32, #tpu.memory_space<vmem>>) attributes {dimension_semantics = [#tpu.dimension_semantics<parallel>, #tpu.dimension_semantics<arbitrary>], iteration_bounds = array<i64: 1, 1>, scalar_prefetch = 0 : i64, scratch_operands = 2 : i64, tpu.core_type = #tpu.core_type<tc>, window_params = [{transform_indices = @transform_0, window_bounds = array<i64: 8, 8, 128>}, {pipeline_mode = #tpu.pipeline_mode<synchronous>, transform_indices = @transform_1, window_bounds = array<i64: 128, 384>}, {pipeline_mode = #tpu.pipeline_mode<synchronous>, transform_indices = @transform_2, window_bounds = array<i64: 128, 384>}, {pipeline_mode = #tpu.pipeline_mode<synchronous>, transform_indices = @transform_3, window_bounds = array<i64: 1, 384>}, {pipeline_mode = #tpu.pipeline_mode<synchronous>, transform_indices = @transform_4, window_bounds = array<i64: 1, 128>}, {transform_indices = @transform_5, window_bounds = array<i64: 8, 8, 128>}]} {
    %c0_i32 = arith.constant 0 : i32
    %0 = arith.cmpi eq, %arg1, %c0_i32 : i32
    %1 = arith.extui %0 : i1 to i32
    %c0_i32_0 = arith.constant 0 : i32
    %2 = arith.cmpi ne, %1, %c0_i32_0 : i32
    scf.if %2 {
      %cst_115 = arith.constant 0.000000e+00 : f32
      %306 = vector.broadcast %cst_115 : f32 to vector<8x128xf32>
      %c0_116 = arith.constant 0 : index
      %c0_117 = arith.constant 0 : index
      %307 = vector.load %arg8[%c0_116, %c0_117] : memref<8x128xf32, #tpu.memory_space<vmem>>, vector<8x128xf32>
      tpu.vector_store %arg8[%c0_116, %c0_117], %306 {strides = array<i32>} : memref<8x128xf32, #tpu.memory_space<vmem>>, vector<8x128xf32>,
    } else {
    }
    %c0 = arith.constant 0 : index
    %c0_1 = arith.constant 0 : index
    %c0_2 = arith.constant 0 : index
    %3 = vector.load %arg2[%c0, %c0_1, %c0_2] : memref<8x8x128xbf16, #tpu.memory_space<vmem>>, vector<8x8x128xbf16>
    %4 = vector.shape_cast %3 : vector<8x8x128xbf16> to vector<64x128xbf16>
    %c0_3 = arith.constant 0 : index
    %c0_4 = arith.constant 0 : index
    %5 = vector.load %arg3[%c0_3, %c0_4] : memref<128x384xbf16, #tpu.memory_space<vmem>>, vector<128x384xbf16>
    %cst = arith.constant dense<0.000000e+00> : vector<64x384xf32>
    %6 = tpu.matmul %4, %5, %cst {dimension_numbers = #tpu.dot_dimension_numbers<[1], [0], [0], [1], [0, 0, 1, 1], [], []>} : vector<64x128xbf16>, vector<128x384xbf16>, vector<64x384xf32> -> vector<64x384xf32>
    %c0_5 = arith.constant 0 : index
    %c0_6 = arith.constant 0 : index
    %7 = vector.load %arg5[%c0_5, %c0_6] : memref<1x384xf32, #tpu.memory_space<vmem>>, vector<1x384xf32>
    %8 = vector.broadcast %7 : vector<1x384xf32> to vector<64x384xf32>
    %9 = arith.addf %6, %8 : vector<64x384xf32>
    %10 = vector.shape_cast %9 : vector<64x384xf32> to vector<8x8x384xf32>
    %c0_7 = arith.constant 0 : index
    %c0_8 = arith.constant 0 : index
    %c0_9 = arith.constant 0 : index
    %11 = vector.load %arg9[%c0_7, %c0_8, %c0_9] : memref<8x8x384xf32, #tpu.memory_space<vmem>>, vector<8x8x384xf32>
    tpu.vector_store %arg9[%c0_7, %c0_8, %c0_9], %10 {strides = array<i32>} : memref<8x8x384xf32, #tpu.memory_space<vmem>>, vector<8x8x384xf32>,
    %c0_10 = arith.constant 0 : index
    %c0_11 = arith.constant 0 : index
    %12 = vector.load %arg4[%c0_10, %c0_11] : memref<128x384xbf16, #tpu.memory_space<vmem>>, vector<128x384xbf16>
    %c0_12 = arith.constant 0 : index
    %c0_13 = arith.constant 0 : index
    %13 = vector.load %arg6[%c0_12, %c0_13] : memref<1x128xf32, #tpu.memory_space<vmem>>, vector<1x128xf32>
    %14 = vector.shape_cast %13 : vector<1x128xf32> to vector<1x128xf32>
    %15 = vector.broadcast %14 : vector<1x128xf32> to vector<8x128xf32>
    %c0_14 = arith.constant 0 : index
    %c0_15 = arith.constant 0 : index
    %16 = vector.load %arg8[%c0_14, %c0_15] : memref<8x128xf32, #tpu.memory_space<vmem>>, vector<8x128xf32>
    %c0_16 = arith.constant 0 : index
    %c0_17 = arith.constant 0 : index
    %c0_18 = arith.constant 0 : index
    %17 = vector.load %arg9[%c0_16, %c0_17, %c0_18] : memref<8x8x384xf32, #tpu.memory_space<vmem>>, vector<1x8x384xf32>
    %18 = vector.shape_cast %17 : vector<1x8x384xf32> to vector<8x384xf32>
    %19 = arith.truncf %16 : vector<8x128xf32> to vector<8x128xbf16>
    %cst_19 = arith.constant dense<0.000000e+00> : vector<8x384xf32>
    %20 = tpu.matmul %19, %12, %cst_19 {dimension_numbers = #tpu.dot_dimension_numbers<[1], [0], [0], [1], [0, 0, 1, 1], [], []>} : vector<8x128xbf16>, vector<128x384xbf16>, vector<8x384xf32> -> vector<8x384xf32>
    %21 = vector.extract_strided_slice %18 {offsets = [0, 0], sizes = [8, 128], strides = [1, 1]} : vector<8x384xf32> to vector<8x128xf32>
    %22 = vector.extract_strided_slice %20 {offsets = [0, 0], sizes = [8, 128], strides = [1, 1]} : vector<8x384xf32> to vector<8x128xf32>
    %23 = arith.addf %21, %22 : vector<8x128xf32>
    %cst_20 = arith.constant 5.000000e-01 : f32
    %24 = vector.broadcast %cst_20 : f32 to vector<8x128xf32>
    %25 = arith.mulf %24, %23 : vector<8x128xf32>
    %26 = math.tanh %25 : vector<8x128xf32>
    %cst_21 = arith.constant 5.000000e-01 : f32
    %27 = vector.broadcast %cst_21 : f32 to vector<8x128xf32>
    %28 = arith.mulf %27, %26 : vector<8x128xf32>
    %cst_22 = arith.constant 5.000000e-01 : f32
    %29 = vector.broadcast %cst_22 : f32 to vector<8x128xf32>
    %30 = arith.addf %28, %29 : vector<8x128xf32>
    %31 = vector.extract_strided_slice %18 {offsets = [0, 128], sizes = [8, 128], strides = [1, 1]} : vector<8x384xf32> to vector<8x128xf32>
    %32 = vector.extract_strided_slice %20 {offsets = [0, 128], sizes = [8, 128], strides = [1, 1]} : vector<8x384xf32> to vector<8x128xf32>
    %33 = arith.addf %31, %32 : vector<8x128xf32>
    %cst_23 = arith.constant 5.000000e-01 : f32
    %34 = vector.broadcast %cst_23 : f32 to vector<8x128xf32>
    %35 = arith.mulf %34, %33 : vector<8x128xf32>
    %36 = math.tanh %35 : vector<8x128xf32>
    %cst_24 = arith.constant 5.000000e-01 : f32
    %37 = vector.broadcast %cst_24 : f32 to vector<8x128xf32>
    %38 = arith.mulf %37, %36 : vector<8x128xf32>
    %cst_25 = arith.constant 5.000000e-01 : f32
    %39 = vector.broadcast %cst_25 : f32 to vector<8x128xf32>
    %40 = arith.addf %38, %39 : vector<8x128xf32>
    %41 = vector.extract_strided_slice %18 {offsets = [0, 256], sizes = [8, 128], strides = [1, 1]} : vector<8x384xf32> to vector<8x128xf32>
    %42 = vector.extract_strided_slice %20 {offsets = [0, 256], sizes = [8, 128], strides = [1, 1]} : vector<8x384xf32> to vector<8x128xf32>
    %43 = arith.addf %42, %15 : vector<8x128xf32>
    %44 = arith.mulf %30, %43 : vector<8x128xf32>
    %45 = arith.addf %41, %44 : vector<8x128xf32>
    %46 = math.tanh %45 : vector<8x128xf32>
    %47 = arith.subf %16, %46 : vector<8x128xf32>
    %48 = arith.mulf %40, %47 : vector<8x128xf32>
    %49 = arith.addf %46, %48 : vector<8x128xf32>
    %c0_26 = arith.constant 0 : index
    %c0_27 = arith.constant 0 : index
    %c0_28 = arith.constant 0 : index
    %50 = vector.load %arg7[%c0_26, %c0_27, %c0_28] : memref<8x8x128xf32, #tpu.memory_space<vmem>>, vector<1x8x128xf32>
    %51 = vector.shape_cast %50 : vector<1x8x128xf32> to vector<8x128xf32>
    %52 = vector.shape_cast %49 : vector<8x128xf32> to vector<1x8x128xf32>
    tpu.vector_store %arg7[%c0_26, %c0_27, %c0_28], %52 {strides = array<i32>} : memref<8x8x128xf32, #tpu.memory_space<vmem>>, vector<1x8x128xf32>,
    %c1 = arith.constant 1 : index
    %c0_29 = arith.constant 0 : index
    %c0_30 = arith.constant 0 : index
    %53 = vector.load %arg9[%c1, %c0_29, %c0_30] : memref<8x8x384xf32, #tpu.memory_space<vmem>>, vector<1x8x384xf32>
    %54 = vector.shape_cast %53 : vector<1x8x384xf32> to vector<8x384xf32>
    %55 = arith.truncf %49 : vector<8x128xf32> to vector<8x128xbf16>
    %cst_31 = arith.constant dense<0.000000e+00> : vector<8x384xf32>
    %56 = tpu.matmul %55, %12, %cst_31 {dimension_numbers = #tpu.dot_dimension_numbers<[1], [0], [0], [1], [0, 0, 1, 1], [], []>} : vector<8x128xbf16>, vector<128x384xbf16>, vector<8x384xf32> -> vector<8x384xf32>
    %57 = vector.extract_strided_slice %54 {offsets = [0, 0], sizes = [8, 128], strides = [1, 1]} : vector<8x384xf32> to vector<8x128xf32>
    %58 = vector.extract_strided_slice %56 {offsets = [0, 0], sizes = [8, 128], strides = [1, 1]} : vector<8x384xf32> to vector<8x128xf32>
    %59 = arith.addf %57, %58 : vector<8x128xf32>
    %cst_32 = arith.constant 5.000000e-01 : f32
    %60 = vector.broadcast %cst_32 : f32 to vector<8x128xf32>
    %61 = arith.mulf %60, %59 : vector<8x128xf32>
    %62 = math.tanh %61 : vector<8x128xf32>
    %cst_33 = arith.constant 5.000000e-01 : f32
    %63 = vector.broadcast %cst_33 : f32 to vector<8x128xf32>
    %64 = arith.mulf %63, %62 : vector<8x128xf32>
    %cst_34 = arith.constant 5.000000e-01 : f32
    %65 = vector.broadcast %cst_34 : f32 to vector<8x128xf32>
    %66 = arith.addf %64, %65 : vector<8x128xf32>
    %67 = vector.extract_strided_slice %54 {offsets = [0, 128], sizes = [8, 128], strides = [1, 1]} : vector<8x384xf32> to vector<8x128xf32>
    %68 = vector.extract_strided_slice %56 {offsets = [0, 128], sizes = [8, 128], strides = [1, 1]} : vector<8x384xf32> to vector<8x128xf32>
    %69 = arith.addf %67, %68 : vector<8x128xf32>
    %cst_35 = arith.constant 5.000000e-01 : f32
    %70 = vector.broadcast %cst_35 : f32 to vector<8x128xf32>
    %71 = arith.mulf %70, %69 : vector<8x128xf32>
    %72 = math.tanh %71 : vector<8x128xf32>
    %cst_36 = arith.constant 5.000000e-01 : f32
    %73 = vector.broadcast %cst_36 : f32 to vector<8x128xf32>
    %74 = arith.mulf %73, %72 : vector<8x128xf32>
    %cst_37 = arith.constant 5.000000e-01 : f32
    %75 = vector.broadcast %cst_37 : f32 to vector<8x128xf32>
    %76 = arith.addf %74, %75 : vector<8x128xf32>
    %77 = vector.extract_strided_slice %54 {offsets = [0, 256], sizes = [8, 128], strides = [1, 1]} : vector<8x384xf32> to vector<8x128xf32>
    %78 = vector.extract_strided_slice %56 {offsets = [0, 256], sizes = [8, 128], strides = [1, 1]} : vector<8x384xf32> to vector<8x128xf32>
    %79 = arith.addf %78, %15 : vector<8x128xf32>
    %80 = arith.mulf %66, %79 : vector<8x128xf32>
    %81 = arith.addf %77, %80 : vector<8x128xf32>
    %82 = math.tanh %81 : vector<8x128xf32>
    %83 = arith.subf %49, %82 : vector<8x128xf32>
    %84 = arith.mulf %76, %83 : vector<8x128xf32>
    %85 = arith.addf %82, %84 : vector<8x128xf32>
    %c1_38 = arith.constant 1 : index
    %c0_39 = arith.constant 0 : index
    %c0_40 = arith.constant 0 : index
    %86 = vector.load %arg7[%c1_38, %c0_39, %c0_40] : memref<8x8x128xf32, #tpu.memory_space<vmem>>, vector<1x8x128xf32>
    %87 = vector.shape_cast %86 : vector<1x8x128xf32> to vector<8x128xf32>
    %88 = vector.shape_cast %85 : vector<8x128xf32> to vector<1x8x128xf32>
    tpu.vector_store %arg7[%c1_38, %c0_39, %c0_40], %88 {strides = array<i32>} : memref<8x8x128xf32, #tpu.memory_space<vmem>>, vector<1x8x128xf32>,
    %c2 = arith.constant 2 : index
    %c0_41 = arith.constant 0 : index
    %c0_42 = arith.constant 0 : index
    %89 = vector.load %arg9[%c2, %c0_41, %c0_42] : memref<8x8x384xf32, #tpu.memory_space<vmem>>, vector<1x8x384xf32>
    %90 = vector.shape_cast %89 : vector<1x8x384xf32> to vector<8x384xf32>
    %91 = arith.truncf %85 : vector<8x128xf32> to vector<8x128xbf16>
    %cst_43 = arith.constant dense<0.000000e+00> : vector<8x384xf32>
    %92 = tpu.matmul %91, %12, %cst_43 {dimension_numbers = #tpu.dot_dimension_numbers<[1], [0], [0], [1], [0, 0, 1, 1], [], []>} : vector<8x128xbf16>, vector<128x384xbf16>, vector<8x384xf32> -> vector<8x384xf32>
    %93 = vector.extract_strided_slice %90 {offsets = [0, 0], sizes = [8, 128], strides = [1, 1]} : vector<8x384xf32> to vector<8x128xf32>
    %94 = vector.extract_strided_slice %92 {offsets = [0, 0], sizes = [8, 128], strides = [1, 1]} : vector<8x384xf32> to vector<8x128xf32>
    %95 = arith.addf %93, %94 : vector<8x128xf32>
    %cst_44 = arith.constant 5.000000e-01 : f32
    %96 = vector.broadcast %cst_44 : f32 to vector<8x128xf32>
    %97 = arith.mulf %96, %95 : vector<8x128xf32>
    %98 = math.tanh %97 : vector<8x128xf32>
    %cst_45 = arith.constant 5.000000e-01 : f32
    %99 = vector.broadcast %cst_45 : f32 to vector<8x128xf32>
    %100 = arith.mulf %99, %98 : vector<8x128xf32>
    %cst_46 = arith.constant 5.000000e-01 : f32
    %101 = vector.broadcast %cst_46 : f32 to vector<8x128xf32>
    %102 = arith.addf %100, %101 : vector<8x128xf32>
    %103 = vector.extract_strided_slice %90 {offsets = [0, 128], sizes = [8, 128], strides = [1, 1]} : vector<8x384xf32> to vector<8x128xf32>
    %104 = vector.extract_strided_slice %92 {offsets = [0, 128], sizes = [8, 128], strides = [1, 1]} : vector<8x384xf32> to vector<8x128xf32>
    %105 = arith.addf %103, %104 : vector<8x128xf32>
    %cst_47 = arith.constant 5.000000e-01 : f32
    %106 = vector.broadcast %cst_47 : f32 to vector<8x128xf32>
    %107 = arith.mulf %106, %105 : vector<8x128xf32>
    %108 = math.tanh %107 : vector<8x128xf32>
    %cst_48 = arith.constant 5.000000e-01 : f32
    %109 = vector.broadcast %cst_48 : f32 to vector<8x128xf32>
    %110 = arith.mulf %109, %108 : vector<8x128xf32>
    %cst_49 = arith.constant 5.000000e-01 : f32
    %111 = vector.broadcast %cst_49 : f32 to vector<8x128xf32>
    %112 = arith.addf %110, %111 : vector<8x128xf32>
    %113 = vector.extract_strided_slice %90 {offsets = [0, 256], sizes = [8, 128], strides = [1, 1]} : vector<8x384xf32> to vector<8x128xf32>
    %114 = vector.extract_strided_slice %92 {offsets = [0, 256], sizes = [8, 128], strides = [1, 1]} : vector<8x384xf32> to vector<8x128xf32>
    %115 = arith.addf %114, %15 : vector<8x128xf32>
    %116 = arith.mulf %102, %115 : vector<8x128xf32>
    %117 = arith.addf %113, %116 : vector<8x128xf32>
    %118 = math.tanh %117 : vector<8x128xf32>
    %119 = arith.subf %85, %118 : vector<8x128xf32>
    %120 = arith.mulf %112, %119 : vector<8x128xf32>
    %121 = arith.addf %118, %120 : vector<8x128xf32>
    %c2_50 = arith.constant 2 : index
    %c0_51 = arith.constant 0 : index
    %c0_52 = arith.constant 0 : index
    %122 = vector.load %arg7[%c2_50, %c0_51, %c0_52] : memref<8x8x128xf32, #tpu.memory_space<vmem>>, vector<1x8x128xf32>
    %123 = vector.shape_cast %122 : vector<1x8x128xf32> to vector<8x128xf32>
    %124 = vector.shape_cast %121 : vector<8x128xf32> to vector<1x8x128xf32>
    tpu.vector_store %arg7[%c2_50, %c0_51, %c0_52], %124 {strides = array<i32>} : memref<8x8x128xf32, #tpu.memory_space<vmem>>, vector<1x8x128xf32>,
    %c3 = arith.constant 3 : index
    %c0_53 = arith.constant 0 : index
    %c0_54 = arith.constant 0 : index
    %125 = vector.load %arg9[%c3, %c0_53, %c0_54] : memref<8x8x384xf32, #tpu.memory_space<vmem>>, vector<1x8x384xf32>
    %126 = vector.shape_cast %125 : vector<1x8x384xf32> to vector<8x384xf32>
    %127 = arith.truncf %121 : vector<8x128xf32> to vector<8x128xbf16>
    %cst_55 = arith.constant dense<0.000000e+00> : vector<8x384xf32>
    %128 = tpu.matmul %127, %12, %cst_55 {dimension_numbers = #tpu.dot_dimension_numbers<[1], [0], [0], [1], [0, 0, 1, 1], [], []>} : vector<8x128xbf16>, vector<128x384xbf16>, vector<8x384xf32> -> vector<8x384xf32>
    %129 = vector.extract_strided_slice %126 {offsets = [0, 0], sizes = [8, 128], strides = [1, 1]} : vector<8x384xf32> to vector<8x128xf32>
    %130 = vector.extract_strided_slice %128 {offsets = [0, 0], sizes = [8, 128], strides = [1, 1]} : vector<8x384xf32> to vector<8x128xf32>
    %131 = arith.addf %129, %130 : vector<8x128xf32>
    %cst_56 = arith.constant 5.000000e-01 : f32
    %132 = vector.broadcast %cst_56 : f32 to vector<8x128xf32>
    %133 = arith.mulf %132, %131 : vector<8x128xf32>
    %134 = math.tanh %133 : vector<8x128xf32>
    %cst_57 = arith.constant 5.000000e-01 : f32
    %135 = vector.broadcast %cst_57 : f32 to vector<8x128xf32>
    %136 = arith.mulf %135, %134 : vector<8x128xf32>
    %cst_58 = arith.constant 5.000000e-01 : f32
    %137 = vector.broadcast %cst_58 : f32 to vector<8x128xf32>
    %138 = arith.addf %136, %137 : vector<8x128xf32>
    %139 = vector.extract_strided_slice %126 {offsets = [0, 128], sizes = [8, 128], strides = [1, 1]} : vector<8x384xf32> to vector<8x128xf32>
    %140 = vector.extract_strided_slice %128 {offsets = [0, 128], sizes = [8, 128], strides = [1, 1]} : vector<8x384xf32> to vector<8x128xf32>
    %141 = arith.addf %139, %140 : vector<8x128xf32>
    %cst_59 = arith.constant 5.000000e-01 : f32
    %142 = vector.broadcast %cst_59 : f32 to vector<8x128xf32>
    %143 = arith.mulf %142, %141 : vector<8x128xf32>
    %144 = math.tanh %143 : vector<8x128xf32>
    %cst_60 = arith.constant 5.000000e-01 : f32
    %145 = vector.broadcast %cst_60 : f32 to vector<8x128xf32>
    %146 = arith.mulf %145, %144 : vector<8x128xf32>
    %cst_61 = arith.constant 5.000000e-01 : f32
    %147 = vector.broadcast %cst_61 : f32 to vector<8x128xf32>
    %148 = arith.addf %146, %147 : vector<8x128xf32>
    %149 = vector.extract_strided_slice %126 {offsets = [0, 256], sizes = [8, 128], strides = [1, 1]} : vector<8x384xf32> to vector<8x128xf32>
    %150 = vector.extract_strided_slice %128 {offsets = [0, 256], sizes = [8, 128], strides = [1, 1]} : vector<8x384xf32> to vector<8x128xf32>
    %151 = arith.addf %150, %15 : vector<8x128xf32>
    %152 = arith.mulf %138, %151 : vector<8x128xf32>
    %153 = arith.addf %149, %152 : vector<8x128xf32>
    %154 = math.tanh %153 : vector<8x128xf32>
    %155 = arith.subf %121, %154 : vector<8x128xf32>
    %156 = arith.mulf %148, %155 : vector<8x128xf32>
    %157 = arith.addf %154, %156 : vector<8x128xf32>
    %c3_62 = arith.constant 3 : index
    %c0_63 = arith.constant 0 : index
    %c0_64 = arith.constant 0 : index
    %158 = vector.load %arg7[%c3_62, %c0_63, %c0_64] : memref<8x8x128xf32, #tpu.memory_space<vmem>>, vector<1x8x128xf32>
    %159 = vector.shape_cast %158 : vector<1x8x128xf32> to vector<8x128xf32>
    %160 = vector.shape_cast %157 : vector<8x128xf32> to vector<1x8x128xf32>
    tpu.vector_store %arg7[%c3_62, %c0_63, %c0_64], %160 {strides = array<i32>} : memref<8x8x128xf32, #tpu.memory_space<vmem>>, vector<1x8x128xf32>,
    %c4 = arith.constant 4 : index
    %c0_65 = arith.constant 0 : index
    %c0_66 = arith.constant 0 : index
    %161 = vector.load %arg9[%c4, %c0_65, %c0_66] : memref<8x8x384xf32, #tpu.memory_space<vmem>>, vector<1x8x384xf32>
    %162 = vector.shape_cast %161 : vector<1x8x384xf32> to vector<8x384xf32>
    %163 = arith.truncf %157 : vector<8x128xf32> to vector<8x128xbf16>
    %cst_67 = arith.constant dense<0.000000e+00> : vector<8x384xf32>
    %164 = tpu.matmul %163, %12, %cst_67 {dimension_numbers = #tpu.dot_dimension_numbers<[1], [0], [0], [1], [0, 0, 1, 1], [], []>} : vector<8x128xbf16>, vector<128x384xbf16>, vector<8x384xf32> -> vector<8x384xf32>
    %165 = vector.extract_strided_slice %162 {offsets = [0, 0], sizes = [8, 128], strides = [1, 1]} : vector<8x384xf32> to vector<8x128xf32>
    %166 = vector.extract_strided_slice %164 {offsets = [0, 0], sizes = [8, 128], strides = [1, 1]} : vector<8x384xf32> to vector<8x128xf32>
    %167 = arith.addf %165, %166 : vector<8x128xf32>
    %cst_68 = arith.constant 5.000000e-01 : f32
    %168 = vector.broadcast %cst_68 : f32 to vector<8x128xf32>
    %169 = arith.mulf %168, %167 : vector<8x128xf32>
    %170 = math.tanh %169 : vector<8x128xf32>
    %cst_69 = arith.constant 5.000000e-01 : f32
    %171 = vector.broadcast %cst_69 : f32 to vector<8x128xf32>
    %172 = arith.mulf %171, %170 : vector<8x128xf32>
    %cst_70 = arith.constant 5.000000e-01 : f32
    %173 = vector.broadcast %cst_70 : f32 to vector<8x128xf32>
    %174 = arith.addf %172, %173 : vector<8x128xf32>
    %175 = vector.extract_strided_slice %162 {offsets = [0, 128], sizes = [8, 128], strides = [1, 1]} : vector<8x384xf32> to vector<8x128xf32>
    %176 = vector.extract_strided_slice %164 {offsets = [0, 128], sizes = [8, 128], strides = [1, 1]} : vector<8x384xf32> to vector<8x128xf32>
    %177 = arith.addf %175, %176 : vector<8x128xf32>
    %cst_71 = arith.constant 5.000000e-01 : f32
    %178 = vector.broadcast %cst_71 : f32 to vector<8x128xf32>
    %179 = arith.mulf %178, %177 : vector<8x128xf32>
    %180 = math.tanh %179 : vector<8x128xf32>
    %cst_72 = arith.constant 5.000000e-01 : f32
    %181 = vector.broadcast %cst_72 : f32 to vector<8x128xf32>
    %182 = arith.mulf %181, %180 : vector<8x128xf32>
    %cst_73 = arith.constant 5.000000e-01 : f32
    %183 = vector.broadcast %cst_73 : f32 to vector<8x128xf32>
    %184 = arith.addf %182, %183 : vector<8x128xf32>
    %185 = vector.extract_strided_slice %162 {offsets = [0, 256], sizes = [8, 128], strides = [1, 1]} : vector<8x384xf32> to vector<8x128xf32>
    %186 = vector.extract_strided_slice %164 {offsets = [0, 256], sizes = [8, 128], strides = [1, 1]} : vector<8x384xf32> to vector<8x128xf32>
    %187 = arith.addf %186, %15 : vector<8x128xf32>
    %188 = arith.mulf %174, %187 : vector<8x128xf32>
    %189 = arith.addf %185, %188 : vector<8x128xf32>
    %190 = math.tanh %189 : vector<8x128xf32>
    %191 = arith.subf %157, %190 : vector<8x128xf32>
    %192 = arith.mulf %184, %191 : vector<8x128xf32>
    %193 = arith.addf %190, %192 : vector<8x128xf32>
    %c4_74 = arith.constant 4 : index
    %c0_75 = arith.constant 0 : index
    %c0_76 = arith.constant 0 : index
    %194 = vector.load %arg7[%c4_74, %c0_75, %c0_76] : memref<8x8x128xf32, #tpu.memory_space<vmem>>, vector<1x8x128xf32>
    %195 = vector.shape_cast %194 : vector<1x8x128xf32> to vector<8x128xf32>
    %196 = vector.shape_cast %193 : vector<8x128xf32> to vector<1x8x128xf32>
    tpu.vector_store %arg7[%c4_74, %c0_75, %c0_76], %196 {strides = array<i32>} : memref<8x8x128xf32, #tpu.memory_space<vmem>>, vector<1x8x128xf32>,
    %c5 = arith.constant 5 : index
    %c0_77 = arith.constant 0 : index
    %c0_78 = arith.constant 0 : index
    %197 = vector.load %arg9[%c5, %c0_77, %c0_78] : memref<8x8x384xf32, #tpu.memory_space<vmem>>, vector<1x8x384xf32>
    %198 = vector.shape_cast %197 : vector<1x8x384xf32> to vector<8x384xf32>
    %199 = arith.truncf %193 : vector<8x128xf32> to vector<8x128xbf16>
    %cst_79 = arith.constant dense<0.000000e+00> : vector<8x384xf32>
    %200 = tpu.matmul %199, %12, %cst_79 {dimension_numbers = #tpu.dot_dimension_numbers<[1], [0], [0], [1], [0, 0, 1, 1], [], []>} : vector<8x128xbf16>, vector<128x384xbf16>, vector<8x384xf32> -> vector<8x384xf32>
    %201 = vector.extract_strided_slice %198 {offsets = [0, 0], sizes = [8, 128], strides = [1, 1]} : vector<8x384xf32> to vector<8x128xf32>
    %202 = vector.extract_strided_slice %200 {offsets = [0, 0], sizes = [8, 128], strides = [1, 1]} : vector<8x384xf32> to vector<8x128xf32>
    %203 = arith.addf %201, %202 : vector<8x128xf32>
    %cst_80 = arith.constant 5.000000e-01 : f32
    %204 = vector.broadcast %cst_80 : f32 to vector<8x128xf32>
    %205 = arith.mulf %204, %203 : vector<8x128xf32>
    %206 = math.tanh %205 : vector<8x128xf32>
    %cst_81 = arith.constant 5.000000e-01 : f32
    %207 = vector.broadcast %cst_81 : f32 to vector<8x128xf32>
    %208 = arith.mulf %207, %206 : vector<8x128xf32>
    %cst_82 = arith.constant 5.000000e-01 : f32
    %209 = vector.broadcast %cst_82 : f32 to vector<8x128xf32>
    %210 = arith.addf %208, %209 : vector<8x128xf32>
    %211 = vector.extract_strided_slice %198 {offsets = [0, 128], sizes = [8, 128], strides = [1, 1]} : vector<8x384xf32> to vector<8x128xf32>
    %212 = vector.extract_strided_slice %200 {offsets = [0, 128], sizes = [8, 128], strides = [1, 1]} : vector<8x384xf32> to vector<8x128xf32>
    %213 = arith.addf %211, %212 : vector<8x128xf32>
    %cst_83 = arith.constant 5.000000e-01 : f32
    %214 = vector.broadcast %cst_83 : f32 to vector<8x128xf32>
    %215 = arith.mulf %214, %213 : vector<8x128xf32>
    %216 = math.tanh %215 : vector<8x128xf32>
    %cst_84 = arith.constant 5.000000e-01 : f32
    %217 = vector.broadcast %cst_84 : f32 to vector<8x128xf32>
    %218 = arith.mulf %217, %216 : vector<8x128xf32>
    %cst_85 = arith.constant 5.000000e-01 : f32
    %219 = vector.broadcast %cst_85 : f32 to vector<8x128xf32>
    %220 = arith.addf %218, %219 : vector<8x128xf32>
    %221 = vector.extract_strided_slice %198 {offsets = [0, 256], sizes = [8, 128], strides = [1, 1]} : vector<8x384xf32> to vector<8x128xf32>
    %222 = vector.extract_strided_slice %200 {offsets = [0, 256], sizes = [8, 128], strides = [1, 1]} : vector<8x384xf32> to vector<8x128xf32>
    %223 = arith.addf %222, %15 : vector<8x128xf32>
    %224 = arith.mulf %210, %223 : vector<8x128xf32>
    %225 = arith.addf %221, %224 : vector<8x128xf32>
    %226 = math.tanh %225 : vector<8x128xf32>
    %227 = arith.subf %193, %226 : vector<8x128xf32>
    %228 = arith.mulf %220, %227 : vector<8x128xf32>
    %229 = arith.addf %226, %228 : vector<8x128xf32>
    %c5_86 = arith.constant 5 : index
    %c0_87 = arith.constant 0 : index
    %c0_88 = arith.constant 0 : index
    %230 = vector.load %arg7[%c5_86, %c0_87, %c0_88] : memref<8x8x128xf32, #tpu.memory_space<vmem>>, vector<1x8x128xf32>
    %231 = vector.shape_cast %230 : vector<1x8x128xf32> to vector<8x128xf32>
    %232 = vector.shape_cast %229 : vector<8x128xf32> to vector<1x8x128xf32>
    tpu.vector_store %arg7[%c5_86, %c0_87, %c0_88], %232 {strides = array<i32>} : memref<8x8x128xf32, #tpu.memory_space<vmem>>, vector<1x8x128xf32>,
    %c6 = arith.constant 6 : index
    %c0_89 = arith.constant 0 : index
    %c0_90 = arith.constant 0 : index
    %233 = vector.load %arg9[%c6, %c0_89, %c0_90] : memref<8x8x384xf32, #tpu.memory_space<vmem>>, vector<1x8x384xf32>
    %234 = vector.shape_cast %233 : vector<1x8x384xf32> to vector<8x384xf32>
    %235 = arith.truncf %229 : vector<8x128xf32> to vector<8x128xbf16>
    %cst_91 = arith.constant dense<0.000000e+00> : vector<8x384xf32>
    %236 = tpu.matmul %235, %12, %cst_91 {dimension_numbers = #tpu.dot_dimension_numbers<[1], [0], [0], [1], [0, 0, 1, 1], [], []>} : vector<8x128xbf16>, vector<128x384xbf16>, vector<8x384xf32> -> vector<8x384xf32>
    %237 = vector.extract_strided_slice %234 {offsets = [0, 0], sizes = [8, 128], strides = [1, 1]} : vector<8x384xf32> to vector<8x128xf32>
    %238 = vector.extract_strided_slice %236 {offsets = [0, 0], sizes = [8, 128], strides = [1, 1]} : vector<8x384xf32> to vector<8x128xf32>
    %239 = arith.addf %237, %238 : vector<8x128xf32>
    %cst_92 = arith.constant 5.000000e-01 : f32
    %240 = vector.broadcast %cst_92 : f32 to vector<8x128xf32>
    %241 = arith.mulf %240, %239 : vector<8x128xf32>
    %242 = math.tanh %241 : vector<8x128xf32>
    %cst_93 = arith.constant 5.000000e-01 : f32
    %243 = vector.broadcast %cst_93 : f32 to vector<8x128xf32>
    %244 = arith.mulf %243, %242 : vector<8x128xf32>
    %cst_94 = arith.constant 5.000000e-01 : f32
    %245 = vector.broadcast %cst_94 : f32 to vector<8x128xf32>
    %246 = arith.addf %244, %245 : vector<8x128xf32>
    %247 = vector.extract_strided_slice %234 {offsets = [0, 128], sizes = [8, 128], strides = [1, 1]} : vector<8x384xf32> to vector<8x128xf32>
    %248 = vector.extract_strided_slice %236 {offsets = [0, 128], sizes = [8, 128], strides = [1, 1]} : vector<8x384xf32> to vector<8x128xf32>
    %249 = arith.addf %247, %248 : vector<8x128xf32>
    %cst_95 = arith.constant 5.000000e-01 : f32
    %250 = vector.broadcast %cst_95 : f32 to vector<8x128xf32>
    %251 = arith.mulf %250, %249 : vector<8x128xf32>
    %252 = math.tanh %251 : vector<8x128xf32>
    %cst_96 = arith.constant 5.000000e-01 : f32
    %253 = vector.broadcast %cst_96 : f32 to vector<8x128xf32>
    %254 = arith.mulf %253, %252 : vector<8x128xf32>
    %cst_97 = arith.constant 5.000000e-01 : f32
    %255 = vector.broadcast %cst_97 : f32 to vector<8x128xf32>
    %256 = arith.addf %254, %255 : vector<8x128xf32>
    %257 = vector.extract_strided_slice %234 {offsets = [0, 256], sizes = [8, 128], strides = [1, 1]} : vector<8x384xf32> to vector<8x128xf32>
    %258 = vector.extract_strided_slice %236 {offsets = [0, 256], sizes = [8, 128], strides = [1, 1]} : vector<8x384xf32> to vector<8x128xf32>
    %259 = arith.addf %258, %15 : vector<8x128xf32>
    %260 = arith.mulf %246, %259 : vector<8x128xf32>
    %261 = arith.addf %257, %260 : vector<8x128xf32>
    %262 = math.tanh %261 : vector<8x128xf32>
    %263 = arith.subf %229, %262 : vector<8x128xf32>
    %264 = arith.mulf %256, %263 : vector<8x128xf32>
    %265 = arith.addf %262, %264 : vector<8x128xf32>
    %c6_98 = arith.constant 6 : index
    %c0_99 = arith.constant 0 : index
    %c0_100 = arith.constant 0 : index
    %266 = vector.load %arg7[%c6_98, %c0_99, %c0_100] : memref<8x8x128xf32, #tpu.memory_space<vmem>>, vector<1x8x128xf32>
    %267 = vector.shape_cast %266 : vector<1x8x128xf32> to vector<8x128xf32>
    %268 = vector.shape_cast %265 : vector<8x128xf32> to vector<1x8x128xf32>
    tpu.vector_store %arg7[%c6_98, %c0_99, %c0_100], %268 {strides = array<i32>} : memref<8x8x128xf32, #tpu.memory_space<vmem>>, vector<1x8x128xf32>,
    %c7 = arith.constant 7 : index
    %c0_101 = arith.constant 0 : index
    %c0_102 = arith.constant 0 : index
    %269 = vector.load %arg9[%c7, %c0_101, %c0_102] : memref<8x8x384xf32, #tpu.memory_space<vmem>>, vector<1x8x384xf32>
    %270 = vector.shape_cast %269 : vector<1x8x384xf32> to vector<8x384xf32>
    %271 = arith.truncf %265 : vector<8x128xf32> to vector<8x128xbf16>
    %cst_103 = arith.constant dense<0.000000e+00> : vector<8x384xf32>
    %272 = tpu.matmul %271, %12, %cst_103 {dimension_numbers = #tpu.dot_dimension_numbers<[1], [0], [0], [1], [0, 0, 1, 1], [], []>} : vector<8x128xbf16>, vector<128x384xbf16>, vector<8x384xf32> -> vector<8x384xf32>
    %273 = vector.extract_strided_slice %270 {offsets = [0, 0], sizes = [8, 128], strides = [1, 1]} : vector<8x384xf32> to vector<8x128xf32>
    %274 = vector.extract_strided_slice %272 {offsets = [0, 0], sizes = [8, 128], strides = [1, 1]} : vector<8x384xf32> to vector<8x128xf32>
    %275 = arith.addf %273, %274 : vector<8x128xf32>
    %cst_104 = arith.constant 5.000000e-01 : f32
    %276 = vector.broadcast %cst_104 : f32 to vector<8x128xf32>
    %277 = arith.mulf %276, %275 : vector<8x128xf32>
    %278 = math.tanh %277 : vector<8x128xf32>
    %cst_105 = arith.constant 5.000000e-01 : f32
    %279 = vector.broadcast %cst_105 : f32 to vector<8x128xf32>
    %280 = arith.mulf %279, %278 : vector<8x128xf32>
    %cst_106 = arith.constant 5.000000e-01 : f32
    %281 = vector.broadcast %cst_106 : f32 to vector<8x128xf32>
    %282 = arith.addf %280, %281 : vector<8x128xf32>
    %283 = vector.extract_strided_slice %270 {offsets = [0, 128], sizes = [8, 128], strides = [1, 1]} : vector<8x384xf32> to vector<8x128xf32>
    %284 = vector.extract_strided_slice %272 {offsets = [0, 128], sizes = [8, 128], strides = [1, 1]} : vector<8x384xf32> to vector<8x128xf32>
    %285 = arith.addf %283, %284 : vector<8x128xf32>
    %cst_107 = arith.constant 5.000000e-01 : f32
    %286 = vector.broadcast %cst_107 : f32 to vector<8x128xf32>
    %287 = arith.mulf %286, %285 : vector<8x128xf32>
    %288 = math.tanh %287 : vector<8x128xf32>
    %cst_108 = arith.constant 5.000000e-01 : f32
    %289 = vector.broadcast %cst_108 : f32 to vector<8x128xf32>
    %290 = arith.mulf %289, %288 : vector<8x128xf32>
    %cst_109 = arith.constant 5.000000e-01 : f32
    %291 = vector.broadcast %cst_109 : f32 to vector<8x128xf32>
    %292 = arith.addf %290, %291 : vector<8x128xf32>
    %293 = vector.extract_strided_slice %270 {offsets = [0, 256], sizes = [8, 128], strides = [1, 1]} : vector<8x384xf32> to vector<8x128xf32>
    %294 = vector.extract_strided_slice %272 {offsets = [0, 256], sizes = [8, 128], strides = [1, 1]} : vector<8x384xf32> to vector<8x128xf32>
    %295 = arith.addf %294, %15 : vector<8x128xf32>
    %296 = arith.mulf %282, %295 : vector<8x128xf32>
    %297 = arith.addf %293, %296 : vector<8x128xf32>
    %298 = math.tanh %297 : vector<8x128xf32>
    %299 = arith.subf %265, %298 : vector<8x128xf32>
    %300 = arith.mulf %292, %299 : vector<8x128xf32>
    %301 = arith.addf %298, %300 : vector<8x128xf32>
    %c7_110 = arith.constant 7 : index
    %c0_111 = arith.constant 0 : index
    %c0_112 = arith.constant 0 : index
    %302 = vector.load %arg7[%c7_110, %c0_111, %c0_112] : memref<8x8x128xf32, #tpu.memory_space<vmem>>, vector<1x8x128xf32>
    %303 = vector.shape_cast %302 : vector<1x8x128xf32> to vector<8x128xf32>
    %304 = vector.shape_cast %301 : vector<8x128xf32> to vector<1x8x128xf32>
    tpu.vector_store %arg7[%c7_110, %c0_111, %c0_112], %304 {strides = array<i32>} : memref<8x8x128xf32, #tpu.memory_space<vmem>>, vector<1x8x128xf32>,
    %c0_113 = arith.constant 0 : index
    %c0_114 = arith.constant 0 : index
    %305 = vector.load %arg8[%c0_113, %c0_114] : memref<8x128xf32, #tpu.memory_space<vmem>>, vector<8x128xf32>
    tpu.vector_store %arg8[%c0_113, %c0_114], %301 {strides = array<i32>} : memref<8x128xf32, #tpu.memory_space<vmem>>, vector<8x128xf32>,
    return
  }
  func.func @transform_0(%arg0: i32, %arg1: i32) -> (i32, i32, i32) {
    %c0_i32 = arith.constant 0 : i32
    %c0_i32_0 = arith.constant 0 : i32
    return %arg1, %arg0, %c0_i32 : i32, i32, i32
  }
  func.func @transform_1(%arg0: i32, %arg1: i32) -> (i32, i32) {
    %c0_i32 = arith.constant 0 : i32
    %c0_i32_0 = arith.constant 0 : i32
    %c0_i32_1 = arith.constant 0 : i32
    return %c0_i32, %c0_i32_0 : i32, i32
  }
  func.func @transform_2(%arg0: i32, %arg1: i32) -> (i32, i32) {
    %c0_i32 = arith.constant 0 : i32
    %c0_i32_0 = arith.constant 0 : i32
    %c0_i32_1 = arith.constant 0 : i32
    return %c0_i32, %c0_i32_0 : i32, i32
  }
  func.func @transform_3(%arg0: i32, %arg1: i32) -> (i32, i32) {
    %c0_i32 = arith.constant 0 : i32
    %c0_i32_0 = arith.constant 0 : i32
    %c0_i32_1 = arith.constant 0 : i32
    return %c0_i32, %c0_i32_0 : i32, i32
  }
  func.func @transform_4(%arg0: i32, %arg1: i32) -> (i32, i32) {
    %c0_i32 = arith.constant 0 : i32
    %c0_i32_0 = arith.constant 0 : i32
    %c0_i32_1 = arith.constant 0 : i32
    return %c0_i32, %c0_i32_0 : i32, i32
  }
  func.func @transform_5(%arg0: i32, %arg1: i32) -> (i32, i32, i32) {
    %c0_i32 = arith.constant 0 : i32
    %c0_i32_0 = arith.constant 0 : i32
    return %arg1, %arg0, %c0_i32 : i32, i32, i32
  }
}

</mosaic_0001>

<bundles_post_ra>
// kernel: gru_layer_forward.1
= control target key start
LH: loop header
LB: loop body
LE: loop exit
PB: predicated region body
PF: predicated region fallthrough
CT: control target
= control target key end

     0   :  { %v2589_v2 = vmov 0   ;;  %v2591_v34 = vmov 0.0   ;;  %s2583_s0 = inlined_call_operand.vmem [shape: bf16[8,8,128], index: 0, kind: input, shape index: {}]   ;;  %s2584_s1 = inlined_call_operand.vmem [shape: bf16[128,384], index: 1, kind: input, shape index: {}]   ;;  %s2585_s2 = inlined_call_operand.vmem [shape: bf16[128,384], index: 2, kind: input, shape index: {}]   ;;  %s2586_s3 = inlined_call_operand.vmem [shape: f32[1,384], index: 3, kind: input, shape index: {}]   ;;  %s2587_s4 = inlined_call_operand.vmem [shape: f32[1,128], index: 4, kind: input, shape index: {}]   ;;  %s2588_s5 = inlined_call_operand.hbm [shape: f32[8,8,128], index: 5, kind: output, shape index: {}]  }
   0x1   :  { %v1749_v0 = vld [vmem:[%s2584_s1 + $0x4] ss:$12 sps:$4 sm:$0xff]   ;;  %v1751_v1 = vld [vmem:[%s2584_s1] ss:$12 sps:$4 sm:$0xff]   ;;  %268 = vmatprep.mubr.bf16.mxu0 %v2589_v2  ;;  %v1752_v3 = vld [vmem:[%s2584_s1 + $0x1c] ss:$12 sps:$4 sm:$0xff]  }
   0x2   :  { %236 = vmatprep.subr.bf16.mxu0 %v1749_v0  ;;  %v1754_v4 = vld [vmem:[%s2584_s1 + $0x18] ss:$12 sps:$4 sm:$0xff]   ;;  %v1755_v5 = vld [vmem:[%s2584_s1 + $0x34] ss:$12 sps:$4 sm:$0xff]   ;;  %v1757_v7 = vld [vmem:[%s2584_s1 + $0x30] ss:$12 sps:$4 sm:$0xff]  }
   0x3   :  { %237 = vmatpush1.bf16.msra.mxu0 %v1751_v1  ;;  %v1761_v6 = vld [vmem:[%s2584_s1 + $0x8] ss:$12 sps:$4 sm:$0xff]   ;;  %v1758_v8 = vld [vmem:[%s2584_s1 + $0x4c] ss:$12 sps:$4 sm:$0xff]   ;;  %v1762_v12 = vld [vmem:[%s2584_s1 + $0x64] ss:$12 sps:$4 sm:$0xff]  }
   0x4   :  { %238 = vmatprep.subr.bf16.mxu0 %v1752_v3  ;;  %1558 = vmatprep.subr.bf16.mxu1 %v1761_v6  ;;  %v1765_v9 = vld [vmem:[%s2584_s1 + $0x20] ss:$12 sps:$4 sm:$0xff]   ;;  %v1769_v10 = vld [vmem:[%s2584_s1 + $0x38] ss:$12 sps:$4 sm:$0xff]   ;;  %v1760_v11 = vld [vmem:[%s2584_s1 + $0x48] ss:$12 sps:$4 sm:$0xff]  }
   0x5   :  { %1559 = vmatpush3.bf16.msra.mxu1 %v1761_v6  ;;  %v1764_v13 = vld [vmem:[%s2584_s1 + $0x60] ss:$12 sps:$4 sm:$0xff]   ;;  %v1773_v14 = vld [vmem:[%s2584_s1 + $0x50] ss:$12 sps:$4 sm:$0xff]   ;;  %v1777_v17 = vld [vmem:[%s2584_s1 + $0x68] ss:$12 sps:$4 sm:$0xff]  }
   0x6   :  { %1560 = vmatprep.subr.bf16.mxu1 %v1765_v9  ;;  %v1766_v15 = vld [vmem:[%s2584_s1 + $0x7c] ss:$12 sps:$4 sm:$0xff]   ;;  %v1778_v16 = vld [vmem:[%s2583_s0] sm:$0xff]   ;;  %v1774_v22 = vld [vmem:[%s2584_s1 + $0xac] ss:$12 sps:$4 sm:$0xff]  }
   0x7   :  { %239 = vmatpush1.bf16.msra.mxu0 %v1754_v4  ;;  %1574 = vmatprep.mubr.bf16.mxu1 %v1778_v16  ;;  %v1768_v18 = vld [vmem:[%s2584_s1 + $0x78] ss:$12 sps:$4 sm:$0xff]   ;;  %v1770_v19 = vld [vmem:[%s2584_s1 + $0x94] ss:$12 sps:$4 sm:$0xff]   ;;  %v1772_v21 = vld [vmem:[%s2584_s1 + $0x90] ss:$12 sps:$4 sm:$0xff]  }
   0x8   :  { %240 = vmatprep.subr.bf16.mxu0 %v1755_v5  ;;  %v1782_v20 = vld [vmem:[%s2584_s1 + $0x80] ss:$12 sps:$4 sm:$0xff]   ;;  %v1786_v23 = vld [vmem:[%s2584_s1 + $0x98] ss:$12 sps:$4 sm:$0xff]   ;;  %v1776_v24 = vld [vmem:[%s2584_s1 + $0xa8] ss:$12 sps:$4 sm:$0xff]  }
   0x9   :  { %1561 = vmatpush3.bf16.msra.mxu1 %v1765_v9  ;;  %v2016_v25 = vld [vmem:[%s2585_s2 + $0x4] ss:$12 sps:$4 sm:$0xff]   ;;  %v2024_v27 = vld [vmem:[%s2585_s2] ss:$12 sps:$4 sm:$0xff]   ;;  %v2030_v28 = vld [vmem:[%s2585_s2 + $0x1c] ss:$12 sps:$4 sm:$0xff]  }
   0xa   :  { %1562 = vmatprep.subr.bf16.mxu1 %v1769_v10  ;;  %v1791_v26 = vld [vmem:[%s2584_s1 + $0xb0] ss:$12 sps:$4 sm:$0xff]   ;;  %v2036_v29 = vld [vmem:[%s2585_s2 + $0x18] ss:$12 sps:$4 sm:$0xff]   ;;  %v1787_v30 = vld [vmem:[%s2583_s0 + $0x8] sm:$0xff]  }
   0xb   :  { %241 = vmatpush1.bf16.msra.mxu0 %v1757_v7  ;;  %v2046_v31 = vld [vmem:[%s2585_s2 + $0x34] ss:$12 sps:$4 sm:$0xff]   ;;  %v2056_v33 = vld [vmem:[%s2585_s2 + $0x30] ss:$12 sps:$4 sm:$0xff]   ;;  %v2067_v36 = vld [vmem:[%s2585_s2 + $0x4c] ss:$12 sps:$4 sm:$0xff]  }
   0xc   :  { %242 = vmatprep.subr.bf16.mxu0 %v1758_v8  ;;  %v2051_v32 = vld [vmem:[%s2585_s2 + $0x8] ss:$12 sps:$4 sm:$0xff]   ;;  %v2073_v37 = vld [vmem:[%s2585_s2 + $0x20] ss:$12 sps:$4 sm:$0xff]  }
   0xd   :  { %1563 = vmatpush3.bf16.msra.mxu1 %v1769_v10  ;;  %v1795_v35 = vld [vmem:[%s2583_s0 + $0x10] sm:$0xff]  }
   0xe   :  { %1564 = vmatprep.subr.bf16.mxu1 %v1773_v14 }
   0xf   :  { %243 = vmatpush1.bf16.msra.mxu0 %v1760_v11 }
  0x10   :  { %244 = vmatprep.subr.bf16.mxu0 %v1762_v12 }
  0x11   :  { %1565 = vmatpush3.bf16.msra.mxu1 %v1773_v14 }
  0x12   :  { %1566 = vmatprep.subr.bf16.mxu1 %v1777_v17 }
  0x13   :  { %245 = vmatpush1.bf16.msra.mxu0 %v1764_v13 }
  0x14   :  { %246 = vmatprep.subr.bf16.mxu0 %v1766_v15 }
  0x15   :  { %1567 = vmatpush3.bf16.msra.mxu1 %v1777_v17 }
  0x16   :  { %1568 = vmatprep.subr.bf16.mxu1 %v1782_v20 }
  0x17   :  { %247 = vmatpush1.bf16.msra.mxu0 %v1768_v18 }
  0x18   :  { %248 = vmatprep.subr.bf16.mxu0 %v1770_v19 }
  0x19   :  { %1569 = vmatpush3.bf16.msra.mxu1 %v1782_v20 }
  0x1a   :  { %1570 = vmatprep.subr.bf16.mxu1 %v1786_v23 }
  0x1b   :  { %249 = vmatpush1.bf16.msra.mxu0 %v1772_v21 }
  0x1c   :  { %250 = vmatprep.subr.bf16.mxu0 %v1774_v22 }
  0x1d   :  { %1571 = vmatpush3.bf16.msra.mxu1 %v1786_v23 }
  0x1e   :  { %1572 = vmatprep.subr.bf16.mxu1 %v1791_v26 }
  0x1f   :  { %251 = vmatpush1.bf16.msra.mxu0 %v1776_v24 }
  0x20   :  { %570 = vmatprep.subr.bf16.mxu0 %v2016_v25 }
  0x21   :  { %1573 = vmatpush3.bf16.msra.mxu1 %v1791_v26 }
  0x22   :  { %269 = vmatmul.mubr.bf16.vlgmr.msra.gmra.mrb[0].mxu0 %v1778_v16  ;;  %1582 = vmatprep.subr.bf16.mxu1 %v2591_v34 }
  0x23   :  { %571 = vmatpush1.bf16.msra.mxu0 %v2024_v27  ;;  %278 = vmatprep.mubr.bf16.mxu0 %v2589_v2 }
  0x24   :  { %572 = vmatprep.subr.bf16.mxu0 %v2030_v28  ;;  %1575 = vmatmul.mubr.bf16.vlgmr.msra.gmra.mrb[0].mxu1 %v1787_v30 }
  0x25   :  { %1583 = vmatpush3.bf16.msra.mxu1 %v2051_v32  ;;  %1578 = vmatprep.mubr.bf16.mxu1 %v1795_v35 }
  0x27   :  { %573 = vmatpush1.bf16.msra.mxu0 %v2036_v29 }
  0x28   :  { %574 = vmatprep.subr.bf16.mxu0 %v2046_v31 }
  0x29   :  { %10 = vsyncpa [#allocation5], 0  ;;  %1584 = vmatprep.subr.bf16.mxu1 %v2591_v34  ;;  %v2080_v38 = vld [vmem:[%s2585_s2 + $0x48] ss:$12 sps:$4 sm:$0xff]   ;;  %v2087_v39 = vld [vmem:[%s2585_s2 + $0x64] ss:$12 sps:$4 sm:$0xff]   ;;  %v69_v55 = vlaneseq }
  0x2a   :  { %279 = vmatmul.mubr.bf16.gmra.mrb[4].mxu0 %v1787_v30  ;;  %1585 = vmatpush3.bf16.msra.mxu1 %v2073_v37  ;;  %v2093_v40 = vld [vmem:[%s2585_s2 + $0x38] ss:$12 sps:$4 sm:$0xff]   ;;  %v2103_v42 = vld [vmem:[%s2585_s2 + $0x60] ss:$12 sps:$4 sm:$0xff]   ;;  %v2109_v43 = vld [vmem:[%s2585_s2 + $0x7c] ss:$12 sps:$4 sm:$0xff]  }
  0x2b   :  { %575 = vmatpush1.bf16.msra.mxu0 %v2056_v33  ;;  %288 = vmatprep.mubr.bf16.mxu0 %v2589_v2  ;;  %v1804_v41 = vld [vmem:[%s2583_s0 + $0x18] sm:$0xff]   ;;  %vm1905_vm0 = vmmov 0   ;;  %v2131_v46 = vld [vmem:[%s2585_s2 + $0x94] ss:$12 sps:$4 sm:$0xff]   ;;  %v1906_v54 = vmov 0.0|0.0   ;;  %v70_v56 = vshrl.u32 %v69_v55, 7 }
  0x2c   :  { %576 = vmatprep.subr.bf16.mxu0 %v2067_v36  ;;  %1586 = vmatprep.subr.bf16.mxu1 %v2591_v34  ;;  %v2115_v44 = vld [vmem:[%s2585_s2 + $0x50] ss:$12 sps:$4 sm:$0xff]   ;;  %v2124_v45 = vld [vmem:[%s2585_s2 + $0x78] ss:$12 sps:$4 sm:$0xff]   ;;  %v2137_v47 = vld [vmem:[%s2585_s2 + $0x68] ss:$12 sps:$4 sm:$0xff]  }
  0x2d   :  { %1579 = vmatmul.mubr.bf16.gmra.mrb[4].mxu1 %v1804_v41  ;;  %v2144_v48 = vld [vmem:[%s2585_s2 + $0x90] ss:$12 sps:$4 sm:$0xff]   ;;  %v2150_v49 = vld [vmem:[%s2585_s2 + $0xac] ss:$12 sps:$4 sm:$0xff]   ;;  %v2163_v51 = vld [vmem:[%s2585_s2 + $0xa8] ss:$12 sps:$4 sm:$0xff]  }
  0x2e   :  { %1587 = vmatpush3.bf16.msra.mxu1 %v2093_v40  ;;  %1598 = vmatprep.mubr.msk.bf16.mxu1 %vm1905_vm0, %v2591_v34  ;;  %v2156_v50 = vld [vmem:[%s2585_s2 + $0x80] ss:$12 sps:$4 sm:$0xff]   ;;  %v2171_v52 = vld [vmem:[%s2585_s2 + $0x98] ss:$12 sps:$4 sm:$0xff]   ;;  %v2180_v53 = vld [vmem:[%s2585_s2 + $0xb0] ss:$12 sps:$4 sm:$0xff]  }
  0x2f   :  { %577 = vmatpush1.bf16.msra.mxu0 %v2080_v38  ;;  %1588 = vmatprep.subr.bf16.mxu1 %v2591_v34  ;;  %v71_v57 = vsub.s32 0, %v70_v56  ;;  %v67_v58 = vld [vmem:[%s2586_s3] sm:$0x7]  ;;  %v75_v59 = vsub.s32 1, %v70_v56  ;;  %v79_v60 = vsub.s32 2, %v70_v56 }
  0x30   :  { %578 = vmatprep.subr.bf16.mxu0 %v2087_v39 }
  0x31   :  { %v72_v62 = vrot.slane %v67_v58, %v71_v57  ;;  %v76_v0 = vrot.slane %v67_v58, %v75_v59  ;;  %v80_v5 = vrot.slane %v67_v58, %v79_v60 }
  0x32   :  { %289 = vmatmul.mubr.bf16.gmra.mrb[8].mxu0 %v1795_v35  ;;  %1589 = vmatpush3.bf16.msra.mxu1 %v2115_v44 }
  0x33   :  { %579 = vmatpush1.bf16.msra.mxu0 %v2103_v42  ;;  %298 = vmatprep.mubr.bf16.mxu0 %v2589_v2 }
  0x34   :  { %580 = vmatprep.subr.bf16.mxu0 %v2109_v43  ;;  %1590 = vmatprep.subr.bf16.mxu1 %v2591_v34 }
  0x36   :  { %1591 = vmatpush3.bf16.msra.mxu1 %v2137_v47 }
  0x37   :  { %581 = vmatpush1.bf16.msra.mxu0 %v2124_v45  ;;  %1592 = vmatprep.subr.bf16.mxu1 %v2591_v34 }
  0x38   :  { %582 = vmatprep.subr.bf16.mxu0 %v2131_v46 }
  0x3a   :  { %299 = vmatmul.mubr.bf16.gmra.mrb[12].mxu0 %v1804_v41  ;;  %1593 = vmatpush3.bf16.msra.mxu1 %v2156_v50 }
  0x3b   :  { %583 = vmatpush1.bf16.msra.mxu0 %v2144_v48  ;;  %602 = vmatprep.mubr.bf16.mxu0 %v2589_v2 }
  0x3c   :  { %584 = vmatprep.subr.bf16.mxu0 %v2150_v49  ;;  %1594 = vmatprep.subr.bf16.mxu1 %v2591_v34 }
  0x3e   :  { %1595 = vmatpush3.bf16.msra.mxu1 %v2171_v52 }
  0x3f   :  { %585 = vmatpush1.bf16.msra.mxu0 %v2163_v51  ;;  %1596 = vmatprep.subr.bf16.mxu1 %v2591_v34 }
  0x40   :  { %674 = vmatprep.subr.bf16.mxu0 %v2016_v25 }
  0x42   :  { %603 = vmatmul.mubr.bf16.vlgmr.msra.gmra.mrb[16].mxu0 %v1906_v54  ;;  %1597 = vmatpush3.bf16.msra.mxu1 %v2180_v53 }
  0x43   :  { %675 = vmatpush1.bf16.msra.mxu0 %v2024_v27  ;;  %706 = vmatprep.mubr.bf16.mxu0 %v2589_v2 }
  0x44   :  { %676 = vmatprep.subr.bf16.mxu0 %v2030_v28  ;;  %1602 = vmatprep.subr.bf16.mxu1 %v2591_v34 }
  0x45   :  { %1599 = vmatmul.mubr.bf16.vlgmr.msra.gmra.mrb[8].mxu1 %v1906_v54 }
  0x46   :  { %1603 = vmatpush3.bf16.msra.mxu1 %v2051_v32  ;;  %1618 = vmatprep.mubr.msk.bf16.mxu1 %vm1905_vm0, %v2591_v34 }
  0x47   :  { %677 = vmatpush1.bf16.msra.mxu0 %v2036_v29  ;;  %1604 = vmatprep.subr.bf16.mxu1 %v2591_v34 }
  0x48   :  { %678 = vmatprep.subr.bf16.mxu0 %v2046_v31 }
  0x4a   :  { %1605 = vmatpush3.bf16.msra.mxu1 %v2073_v37 }
  0x4b   :  { %679 = vmatpush1.bf16.msra.mxu0 %v2056_v33  ;;  %1606 = vmatprep.subr.bf16.mxu1 %v2591_v34 }
  0x4c   :  { %680 = vmatprep.subr.bf16.mxu0 %v2067_v36 }
  0x4e   :  { %1607 = vmatpush3.bf16.msra.mxu1 %v2093_v40 }
  0x4f   :  { %681 = vmatpush1.bf16.msra.mxu0 %v2080_v38  ;;  %1608 = vmatprep.subr.bf16.mxu1 %v2591_v34 }
  0x50   :  { %682 = vmatprep.subr.bf16.mxu0 %v2087_v39 }
  0x52   :  { %1609 = vmatpush3.bf16.msra.mxu1 %v2115_v44 }
  0x53   :  { %683 = vmatpush1.bf16.msra.mxu0 %v2103_v42  ;;  %1610 = vmatprep.subr.bf16.mxu1 %v2591_v34 }
  0x54   :  { %684 = vmatprep.subr.bf16.mxu0 %v2109_v43 }
  0x56   :  { %1611 = vmatpush3.bf16.msra.mxu1 %v2137_v47 }
  0x57   :  { %685 = vmatpush1.bf16.msra.mxu0 %v2124_v45  ;;  %1612 = vmatprep.subr.bf16.mxu1 %v2591_v34 }
  0x58   :  { %686 = vmatprep.subr.bf16.mxu0 %v2131_v46 }
  0x5a   :  { %1613 = vmatpush3.bf16.msra.mxu1 %v2156_v50 }
  0x5b   :  { %687 = vmatpush1.bf16.msra.mxu0 %v2144_v48  ;;  %1614 = vmatprep.subr.bf16.mxu1 %v2591_v34 }
  0x5c   :  { %688 = vmatprep.subr.bf16.mxu0 %v2150_v49 }
  0x5e   :  { %1615 = vmatpush3.bf16.msra.mxu1 %v2171_v52 }
  0x5f   :  { %689 = vmatpush1.bf16.msra.mxu0 %v2163_v51  ;;  %1616 = vmatprep.subr.bf16.mxu1 %v2591_v34 }
  0x60   :  { %779 = vmatprep.subr.bf16.mxu0 %v2016_v25 }
  0x62   :  { %1617 = vmatpush3.bf16.msra.mxu1 %v2180_v53 }
  0x63   :  { %1622 = vmatprep.subr.bf16.mxu1 %v2591_v34 }
  0xf5   :  { %v270_v61 = vpop.f32.mrb[0].mxu0 }
  0xf6   :  { %v272_v63 = vpop.f32.mrb[1].mxu0 }
  0xf7   :  { %v274_v1 = vpop.f32.mrb[2].mxu0  ;;  %v1576_v7 = vpop.f32.mrb[0].mxu1 }
  0xf8   :  { %v2223_v3 = vadd.f32 %v274_v1, %v72_v62  ;;  %v276_v4 = vpop.f32.mrb[3].mxu0  ;;  %v2227_v8 = vadd.f32 %v1576_v7, %v80_v5  ;;  %v343_v9 = vpop.f32.mrb[1].mxu1 }
  0xf9   :  { %v2225_v6 = vadd.f32 %v276_v4, %v76_v0  ;;  %v1577_v11 = vpop.f32.mrb[2].mxu1 }
  0xfa   :  { %v2231_v14 = vadd.f32 %v1577_v11, %v80_v5  ;;  %v346_v15 = vpop.f32.mrb[3].mxu1 }
  0xfb   :  { %v2235_v18 = vadd.f32 %v346_v15, %v80_v5 }
  0xfd   :  { %v280_v10 = vpop.f32.mrb[4].mxu0 }
  0xfe   :  { %v2229_v12 = vadd.f32 %v280_v10, %v72_v62  ;;  %v282_v13 = vpop.f32.mrb[5].mxu0 }
  0xff   :  { %v2233_v16 = vadd.f32 %v282_v13, %v76_v0  ;;  %v284_v17 = vpop.f32.mrb[6].mxu0 }
 0x100   :  { %v2237_v19 = vadd.f32 %v284_v17, %v72_v62  ;;  %v286_v20 = vpop.f32.mrb[7].mxu0  ;;  %v1580_v22 = vpop.f32.mrb[4].mxu1 }
 0x101   :  { %v2239_v21 = vadd.f32 %v286_v20, %v76_v0  ;;  %v2241_v23 = vadd.f32 %v1580_v22, %v80_v5  ;;  %v359_v24 = vpop.f32.mrb[5].mxu1 }
 0x102   :  { %v2243_v30 = vadd.f32 %v359_v24, %v80_v5  ;;  %v1581_v35 = vpop.f32.mrb[6].mxu1  ;;  %v271_v24 = vadd.f32 %v270_v61, %v72_v62 }
 0x103   :  { %2593 = vst [vmem:[#allocation7_spill] sm:$0xff] %v2241_v23  ;;  %v2247_v55 = vadd.f32 %v1581_v35, %v80_v5  ;;  %v362_v56 = vpop.f32.mrb[7].mxu1 }
 0x104   :  { %v2251_v59 = vadd.f32 %v362_v56, %v80_v5 }
 0x105   :  { %v290_v26 = vpop.f32.mrb[8].mxu0  ;;  %2594 = vst [vmem:[#allocation8_spill] sm:$0xff] %v2247_v55 }
 0x106   :  { %v2245_v41 = vadd.f32 %v290_v26, %v72_v62  ;;  %v292_v54 = vpop.f32.mrb[9].mxu0  ;;  %v273_v26 = vadd.f32 %v272_v63, %v76_v0 }
 0x107   :  { %v2249_v57 = vadd.f32 %v292_v54, %v76_v0  ;;  %v294_v58 = vpop.f32.mrb[10].mxu0 }
 0x108   :  { %v2253_v60 = vadd.f32 %v294_v58, %v72_v62  ;;  %v296_v1 = vpop.f32.mrb[11].mxu0 }
 0x109   :  { %v2255_v4 = vadd.f32 %v296_v1, %v76_v0 }
 0x10d   :  { %v300_v7 = vpop.f32.mrb[12].mxu0 }
 0x10e   :  { %v2257_v10 = vadd.f32 %v300_v7, %v72_v62  ;;  %v302_v11 = vpop.f32.mrb[13].mxu0 }
 0x10f   :  { %v2259_v13 = vadd.f32 %v302_v11, %v76_v0  ;;  %v304_v15 = vpop.f32.mrb[14].mxu0 }
 0x110   :  { %v2261_v17 = vadd.f32 %v304_v15, %v72_v62  ;;  %v306_v20 = vpop.f32.mrb[15].mxu0  ;;  %v2268_v15 = vld [vmem:[%s2587_s4] ss:$0 sm:$0xff] }
 0x111   :  { %v2263_v22 = vadd.f32 %v306_v20, %v76_v0 }
 0x115   :  { %v604_v35 = vpop.f32.mrb[16].mxu0 }
 0x116   :  { %v651_v54 = vadd.f32 %v604_v35, %v271_v24  ;;  %v606_v56 = vpop.f32.mrb[17].mxu0  ;;  %v344_v24 = vadd.f32 %v343_v9, %v80_v5  ;;  %v2595_v5 = vmov 0.0   ;;  %v2596_v9 = vmov 0  }
 0x117   :  { %v656_v58 = vadd.f32 %v606_v56, %v273_v26  ;;  %v608_v1 = vpop.f32.mrb[18].mxu0 }
 0x118   :  { %v652_v2 = vmul.f32 0.5, %v651_v54  ;;  %v609_v34 = vpop.f32.mrb[19].mxu0  ;;  %v645_v7 = vpop.f32.mrb[8].mxu1 }
 0x119   :  { %v1600_v55 = vpop.f32.mrb[9].mxu1  ;;  %v657_v20 = vmul.f32 0.5, %v656_v58  ;;  %v661_v63 = vadd.f32 %v2268_v15, %v645_v7 }
 0x11a   :  { %1817 = vtanh.f32 %v652_v2  ;;  %v648_v11 = vpop.f32.mrb[10].mxu1 }
 0x11b   :  { %v1601_v23 = vpop.f32.mrb[11].mxu1  ;;  %1819 = vtanh.f32 %v657_v20 }
 0x124   :  { %v1818_v61 = vpop.eup %1817 }
 0x125   :  { %v654_v62 = vmul.f32 0.5, %v1818_v61  ;;  %v1820_v2 = vpop.eup %1819 }
 0x126   :  { %v659_v55 = vmul.f32 0.5, %v1820_v2 }
 0x127   :  { %v655_v0 = vadd.f32 0.5, %v654_v62 }
 0x128   :  { %v660_v23 = vadd.f32 0.5, %v659_v55 }
 0x129   :  { %v662_v26 = vmul.f32 %v661_v63, %v655_v0 }
 0x12b   :  { %v663_v34 = vadd.f32 %v662_v26, %v344_v24 }
 0x12d   :  { %1821 = vtanh.f32 %v663_v34 }
 0x137   :  { %v1822_v35 = vpop.eup %1821 }
 0x138   :  { %v665_v54 = vsub.f32 0.0, %v1822_v35 }
 0x13a   :  { %v666_v56 = vmul.f32 %v665_v54, %v660_v23 }
 0x13c   :  { %v2271_v1 = vadd.f32 %v1822_v35, %v666_v56 }
 0x13e   :  { %668 = vst [vmem:[#allocation4] sm:$0xff] %v2271_v1  ;;  %v673_v58 = vpack.c.bf16 %v2271_v1, %v2271_v1 }
 0x140   :  { %707 = vmatmul.mubr.bf16.vlgmr.msra.gmra.mrb[20].mxu0 %v673_v58  ;;  %1619 = vmatmul.mubr.bf16.vlgmr.msra.gmra.mrb[12].mxu1 %v673_v58 }
 0x141   :  { %780 = vmatpush1.bf16.msra.mxu0 %v2024_v27  ;;  %1623 = vmatpush3.bf16.msra.mxu1 %v2051_v32 }
 0x142   :  { %781 = vmatprep.subr.bf16.mxu0 %v2030_v28  ;;  %1624 = vmatprep.subr.bf16.mxu1 %v2595_v5 }
 0x143   :  { %811 = vmatprep.mubr.bf16.mxu0 %v2596_v9  ;;  %1638 = vmatprep.mubr.msk.bf16.mxu1 %vm1905_vm0, %v2595_v5 }
 0x145   :  { %782 = vmatpush1.bf16.msra.mxu0 %v2036_v29  ;;  %1625 = vmatpush3.bf16.msra.mxu1 %v2073_v37 }
 0x146   :  { %783 = vmatprep.subr.bf16.mxu0 %v2046_v31  ;;  %1626 = vmatprep.subr.bf16.mxu1 %v2595_v5 }
 0x149   :  { %784 = vmatpush1.bf16.msra.mxu0 %v2056_v33  ;;  %1627 = vmatpush3.bf16.msra.mxu1 %v2093_v40 }
 0x14a   :  { %785 = vmatprep.subr.bf16.mxu0 %v2067_v36  ;;  %1628 = vmatprep.subr.bf16.mxu1 %v2595_v5 }
 0x14d   :  { %786 = vmatpush1.bf16.msra.mxu0 %v2080_v38  ;;  %1629 = vmatpush3.bf16.msra.mxu1 %v2115_v44 }
 0x14e   :  { %787 = vmatprep.subr.bf16.mxu0 %v2087_v39  ;;  %1630 = vmatprep.subr.bf16.mxu1 %v2595_v5 }
 0x151   :  { %788 = vmatpush1.bf16.msra.mxu0 %v2103_v42  ;;  %1631 = vmatpush3.bf16.msra.mxu1 %v2137_v47 }
 0x152   :  { %789 = vmatprep.subr.bf16.mxu0 %v2109_v43  ;;  %1632 = vmatprep.subr.bf16.mxu1 %v2595_v5 }
 0x155   :  { %790 = vmatpush1.bf16.msra.mxu0 %v2124_v45  ;;  %1633 = vmatpush3.bf16.msra.mxu1 %v2156_v50 }
 0x156   :  { %791 = vmatprep.subr.bf16.mxu0 %v2131_v46  ;;  %1634 = vmatprep.subr.bf16.mxu1 %v2595_v5 }
 0x159   :  { %792 = vmatpush1.bf16.msra.mxu0 %v2144_v48  ;;  %1635 = vmatpush3.bf16.msra.mxu1 %v2171_v52 }
 0x15a   :  { %793 = vmatprep.subr.bf16.mxu0 %v2150_v49  ;;  %1636 = vmatprep.subr.bf16.mxu1 %v2595_v5 }
 0x15d   :  { %794 = vmatpush1.bf16.msra.mxu0 %v2163_v51  ;;  %1637 = vmatpush3.bf16.msra.mxu1 %v2180_v53 }
 0x15e   :  { %884 = vmatprep.subr.bf16.mxu0 %v2016_v25  ;;  %1642 = vmatprep.subr.bf16.mxu1 %v2595_v5 }
 0x213   :  { %v708_v7 = vpop.f32.mrb[20].mxu0  ;;  %v749_v11 = vpop.f32.mrb[12].mxu1 }
 0x214   :  { %v755_v20 = vadd.f32 %v708_v7, %v2223_v3  ;;  %v710_v61 = vpop.f32.mrb[21].mxu0  ;;  %v1620_v62 = vpop.f32.mrb[13].mxu1  ;;  %v765_v56 = vadd.f32 %v2268_v15, %v749_v11 }
 0x215   :  { %v760_v63 = vadd.f32 %v710_v61, %v2225_v6  ;;  %v712_v0 = vpop.f32.mrb[22].mxu0  ;;  %v752_v24 = vpop.f32.mrb[14].mxu1 }
 0x216   :  { %v756_v26 = vmul.f32 0.5, %v755_v20  ;;  %v713_v34 = vpop.f32.mrb[23].mxu0  ;;  %v1621_v2 = vpop.f32.mrb[15].mxu1 }
 0x217   :  { %v761_v55 = vmul.f32 0.5, %v760_v63 }
 0x218   :  { %1823 = vtanh.f32 %v756_v26 }
 0x219   :  { %1825 = vtanh.f32 %v761_v55 }
 0x222   :  { %v1824_v35 = vpop.eup %1823 }
 0x223   :  { %v758_v23 = vmul.f32 0.5, %v1824_v35  ;;  %v1826_v7 = vpop.eup %1825 }
 0x224   :  { %v763_v62 = vmul.f32 0.5, %v1826_v7 }
 0x225   :  { %v759_v54 = vadd.f32 0.5, %v758_v23 }
 0x226   :  { %v764_v61 = vadd.f32 0.5, %v763_v62 }
 0x227   :  { %v766_v58 = vmul.f32 %v765_v56, %v759_v54 }
 0x229   :  { %v767_v3 = vadd.f32 %v766_v58, %v2235_v18 }
 0x22b   :  { %1827 = vtanh.f32 %v767_v3 }
 0x235   :  { %v1828_v6 = vpop.eup %1827 }
 0x236   :  { %v769_v20 = vsub.f32 %v2271_v1, %v1828_v6 }
 0x238   :  { %v770_v0 = vmul.f32 %v769_v20, %v764_v61 }
 0x23a   :  { %v2316_v24 = vadd.f32 %v1828_v6, %v770_v0 }
 0x23c   :  { %773 = vst [vmem:[#allocation4 + $0x8] sm:$0xff] %v2316_v24  ;;  %v778_v63 = vpack.c.bf16 %v2316_v24, %v2316_v24 }
 0x23e   :  { %812 = vmatmul.mubr.bf16.vlgmr.msra.gmra.mrb[24].mxu0 %v778_v63  ;;  %1639 = vmatmul.mubr.bf16.vlgmr.msra.gmra.mrb[16].mxu1 %v778_v63 }
 0x23f   :  { %885 = vmatpush1.bf16.msra.mxu0 %v2024_v27  ;;  %1643 = vmatpush3.bf16.msra.mxu1 %v2051_v32 }
 0x240   :  { %886 = vmatprep.subr.bf16.mxu0 %v2030_v28  ;;  %1644 = vmatprep.subr.bf16.mxu1 %v2595_v5 }
 0x241   :  { %916 = vmatprep.mubr.bf16.mxu0 %v2596_v9  ;;  %1658 = vmatprep.mubr.msk.bf16.mxu1 %vm1905_vm0, %v2595_v5 }
 0x243   :  { %887 = vmatpush1.bf16.msra.mxu0 %v2036_v29  ;;  %1645 = vmatpush3.bf16.msra.mxu1 %v2073_v37 }
 0x244   :  { %888 = vmatprep.subr.bf16.mxu0 %v2046_v31  ;;  %1646 = vmatprep.subr.bf16.mxu1 %v2595_v5 }
 0x247   :  { %889 = vmatpush1.bf16.msra.mxu0 %v2056_v33  ;;  %1647 = vmatpush3.bf16.msra.mxu1 %v2093_v40 }
 0x248   :  { %890 = vmatprep.subr.bf16.mxu0 %v2067_v36  ;;  %1648 = vmatprep.subr.bf16.mxu1 %v2595_v5 }
 0x24b   :  { %891 = vmatpush1.bf16.msra.mxu0 %v2080_v38  ;;  %1649 = vmatpush3.bf16.msra.mxu1 %v2115_v44 }
 0x24c   :  { %892 = vmatprep.subr.bf16.mxu0 %v2087_v39  ;;  %1650 = vmatprep.subr.bf16.mxu1 %v2595_v5 }
 0x24f   :  { %893 = vmatpush1.bf16.msra.mxu0 %v2103_v42  ;;  %1651 = vmatpush3.bf16.msra.mxu1 %v2137_v47 }
 0x250   :  { %894 = vmatprep.subr.bf16.mxu0 %v2109_v43  ;;  %1652 = vmatprep.subr.bf16.mxu1 %v2595_v5 }
 0x253   :  { %895 = vmatpush1.bf16.msra.mxu0 %v2124_v45  ;;  %1653 = vmatpush3.bf16.msra.mxu1 %v2156_v50 }
 0x254   :  { %896 = vmatprep.subr.bf16.mxu0 %v2131_v46  ;;  %1654 = vmatprep.subr.bf16.mxu1 %v2595_v5 }
 0x257   :  { %897 = vmatpush1.bf16.msra.mxu0 %v2144_v48  ;;  %1655 = vmatpush3.bf16.msra.mxu1 %v2171_v52 }
 0x258   :  { %898 = vmatprep.subr.bf16.mxu0 %v2150_v49  ;;  %1656 = vmatprep.subr.bf16.mxu1 %v2595_v5 }
 0x25b   :  { %899 = vmatpush1.bf16.msra.mxu0 %v2163_v51  ;;  %1657 = vmatpush3.bf16.msra.mxu1 %v2180_v53 }
 0x25c   :  { %989 = vmatprep.subr.bf16.mxu0 %v2016_v25  ;;  %1662 = vmatprep.subr.bf16.mxu1 %v2595_v5 }
 0x311   :  { %v813_v18 = vpop.f32.mrb[24].mxu0  ;;  %v854_v1 = vpop.f32.mrb[16].mxu1 }
 0x312   :  { %v860_v11 = vadd.f32 %v813_v18, %v2229_v12  ;;  %v815_v26 = vpop.f32.mrb[25].mxu0  ;;  %v1640_v34 = vpop.f32.mrb[17].mxu1  ;;  %v870_v6 = vadd.f32 %v2268_v15, %v854_v1 }
 0x313   :  { %v865_v2 = vadd.f32 %v815_v26, %v2233_v16  ;;  %v817_v55 = vpop.f32.mrb[26].mxu0  ;;  %v857_v35 = vpop.f32.mrb[18].mxu1 }
 0x314   :  { %v861_v23 = vmul.f32 0.5, %v860_v11  ;;  %v818_v54 = vpop.f32.mrb[27].mxu0  ;;  %v1641_v56 = vpop.f32.mrb[19].mxu1 }
 0x315   :  { %v866_v58 = vmul.f32 0.5, %v865_v2 }
 0x316   :  { %1829 = vtanh.f32 %v861_v23 }
 0x317   :  { %1831 = vtanh.f32 %v866_v58 }
 0x320   :  { %v1830_v3 = vpop.eup %1829 }
 0x321   :  { %v863_v7 = vmul.f32 0.5, %v1830_v3  ;;  %v1832_v20 = vpop.eup %1831 }
 0x322   :  { %v868_v0 = vmul.f32 0.5, %v1832_v20 }
 0x323   :  { %v864_v62 = vadd.f32 0.5, %v863_v7 }
 0x324   :  { %v869_v63 = vadd.f32 0.5, %v868_v0 }
 0x325   :  { %v871_v61 = vmul.f32 %v870_v6, %v864_v62 }
 0x327   :  { %v872_v12 = vadd.f32 %v871_v61, %v2227_v8 }
 0x329   :  { %1833 = vtanh.f32 %v872_v12 }
 0x333   :  { %v1834_v16 = vpop.eup %1833 }
 0x334   :  { %v874_v18 = vsub.f32 %v2316_v24, %v1834_v16 }
 0x336   :  { %v875_v11 = vmul.f32 %v874_v18, %v869_v63 }
 0x338   :  { %v2361_v26 = vadd.f32 %v1834_v16, %v875_v11 }
 0x33a   :  { %878 = vst [vmem:[#allocation4 + $0x10] sm:$0xff] %v2361_v26  ;;  %v883_v34 = vpack.c.bf16 %v2361_v26, %v2361_v26 }
 0x33c   :  { %917 = vmatmul.mubr.bf16.vlgmr.msra.gmra.mrb[28].mxu0 %v883_v34  ;;  %1659 = vmatmul.mubr.bf16.vlgmr.msra.gmra.mrb[20].mxu1 %v883_v34 }
 0x33d   :  { %990 = vmatpush1.bf16.msra.mxu0 %v2024_v27  ;;  %1663 = vmatpush3.bf16.msra.mxu1 %v2051_v32 }
 0x33e   :  { %991 = vmatprep.subr.bf16.mxu0 %v2030_v28  ;;  %1664 = vmatprep.subr.bf16.mxu1 %v2595_v5 }
 0x33f   :  { %1021 = vmatprep.mubr.bf16.mxu0 %v2596_v9  ;;  %1678 = vmatprep.mubr.msk.bf16.mxu1 %vm1905_vm0, %v2595_v5 }
 0x341   :  { %992 = vmatpush1.bf16.msra.mxu0 %v2036_v29  ;;  %1665 = vmatpush3.bf16.msra.mxu1 %v2073_v37 }
 0x342   :  { %993 = vmatprep.subr.bf16.mxu0 %v2046_v31  ;;  %1666 = vmatprep.subr.bf16.mxu1 %v2595_v5 }
 0x345   :  { %994 = vmatpush1.bf16.msra.mxu0 %v2056_v33  ;;  %1667 = vmatpush3.bf16.msra.mxu1 %v2093_v40 }
 0x346   :  { %995 = vmatprep.subr.bf16.mxu0 %v2067_v36  ;;  %1668 = vmatprep.subr.bf16.mxu1 %v2595_v5 }
 0x349   :  { %996 = vmatpush1.bf16.msra.mxu0 %v2080_v38  ;;  %1669 = vmatpush3.bf16.msra.mxu1 %v2115_v44 }
 0x34a   :  { %997 = vmatprep.subr.bf16.mxu0 %v2087_v39  ;;  %1670 = vmatprep.subr.bf16.mxu1 %v2595_v5 }
 0x34d   :  { %998 = vmatpush1.bf16.msra.mxu0 %v2103_v42  ;;  %1671 = vmatpush3.bf16.msra.mxu1 %v2137_v47 }
 0x34e   :  { %999 = vmatprep.subr.bf16.mxu0 %v2109_v43  ;;  %1672 = vmatprep.subr.bf16.mxu1 %v2595_v5 }
 0x351   :  { %1000 = vmatpush1.bf16.msra.mxu0 %v2124_v45  ;;  %1673 = vmatpush3.bf16.msra.mxu1 %v2156_v50 }
 0x352   :  { %1001 = vmatprep.subr.bf16.mxu0 %v2131_v46  ;;  %1674 = vmatprep.subr.bf16.mxu1 %v2595_v5 }
 0x355   :  { %1002 = vmatpush1.bf16.msra.mxu0 %v2144_v48  ;;  %1675 = vmatpush3.bf16.msra.mxu1 %v2171_v52 }
 0x356   :  { %1003 = vmatprep.subr.bf16.mxu0 %v2150_v49  ;;  %1676 = vmatprep.subr.bf16.mxu1 %v2595_v5 }
 0x359   :  { %1004 = vmatpush1.bf16.msra.mxu0 %v2163_v51  ;;  %1677 = vmatpush3.bf16.msra.mxu1 %v2180_v53 }
 0x35a   :  { %1094 = vmatprep.subr.bf16.mxu0 %v2016_v25  ;;  %1682 = vmatprep.subr.bf16.mxu1 %v2595_v5 }
 0x40f   :  { %v918_v8 = vpop.f32.mrb[28].mxu0  ;;  %v959_v24 = vpop.f32.mrb[20].mxu1 }
 0x410   :  { %v965_v1 = vadd.f32 %v918_v8, %v2237_v19  ;;  %v920_v2 = vpop.f32.mrb[29].mxu0  ;;  %v1660_v55 = vpop.f32.mrb[21].mxu1  ;;  %v975_v12 = vadd.f32 %v2268_v15, %v959_v24 }
 0x411   :  { %v970_v35 = vadd.f32 %v920_v2, %v2239_v21  ;;  %v922_v23 = vpop.f32.mrb[30].mxu0  ;;  %v962_v54 = vpop.f32.mrb[22].mxu1 }
 0x412   :  { %v966_v56 = vmul.f32 0.5, %v965_v1  ;;  %v923_v58 = vpop.f32.mrb[31].mxu0  ;;  %v1661_v3 = vpop.f32.mrb[23].mxu1 }
 0x413   :  { %v971_v7 = vmul.f32 0.5, %v970_v35 }
 0x414   :  { %1835 = vtanh.f32 %v966_v56 }
 0x415   :  { %1837 = vtanh.f32 %v971_v7 }
 0x41e   :  { %v1836_v62 = vpop.eup %1835 }
 0x41f   :  { %v968_v6 = vmul.f32 0.5, %v1836_v62  ;;  %v1838_v0 = vpop.eup %1837 }
 0x420   :  { %v973_v16 = vmul.f32 0.5, %v1838_v0 }
 0x421   :  { %v969_v61 = vadd.f32 0.5, %v968_v6 }
 0x422   :  { %v974_v63 = vadd.f32 0.5, %v973_v16 }
 0x423   :  { %v976_v20 = vmul.f32 %v975_v12, %v969_v61 }
 0x425   :  { %v977_v19 = vadd.f32 %v976_v20, %v2231_v14 }
 0x427   :  { %1839 = vtanh.f32 %v977_v19 }
 0x431   :  { %v1840_v21 = vpop.eup %1839 }
 0x432   :  { %v979_v18 = vsub.f32 %v2361_v26, %v1840_v21 }
 0x434   :  { %v980_v11 = vmul.f32 %v979_v18, %v974_v63 }
 0x436   :  { %v2406_v34 = vadd.f32 %v1840_v21, %v980_v11 }
 0x438   :  { %983 = vst [vmem:[#allocation4 + $0x18] sm:$0xff] %v2406_v34  ;;  %v988_v8 = vpack.c.bf16 %v2406_v34, %v2406_v34 }
 0x43a   :  { %1022 = vmatmul.mubr.bf16.vlgmr.msra.gmra.mrb[32].mxu0 %v988_v8  ;;  %1679 = vmatmul.mubr.bf16.vlgmr.msra.gmra.mrb[24].mxu1 %v988_v8 }
 0x43b   :  { %1095 = vmatpush1.bf16.msra.mxu0 %v2024_v27  ;;  %1683 = vmatpush3.bf16.msra.mxu1 %v2051_v32 }
 0x43c   :  { %1096 = vmatprep.subr.bf16.mxu0 %v2030_v28  ;;  %1684 = vmatprep.subr.bf16.mxu1 %v2595_v5 }
 0x43d   :  { %1126 = vmatprep.mubr.bf16.mxu0 %v2596_v9  ;;  %1698 = vmatprep.mubr.msk.bf16.mxu1 %vm1905_vm0, %v2595_v5 }
 0x43f   :  { %1097 = vmatpush1.bf16.msra.mxu0 %v2036_v29  ;;  %1685 = vmatpush3.bf16.msra.mxu1 %v2073_v37 }
 0x440   :  { %1098 = vmatprep.subr.bf16.mxu0 %v2046_v31  ;;  %1686 = vmatprep.subr.bf16.mxu1 %v2595_v5 }
 0x443   :  { %1099 = vmatpush1.bf16.msra.mxu0 %v2056_v33  ;;  %1687 = vmatpush3.bf16.msra.mxu1 %v2093_v40 }
 0x444   :  { %1100 = vmatprep.subr.bf16.mxu0 %v2067_v36  ;;  %1688 = vmatprep.subr.bf16.mxu1 %v2595_v5 }
 0x447   :  { %1101 = vmatpush1.bf16.msra.mxu0 %v2080_v38  ;;  %1689 = vmatpush3.bf16.msra.mxu1 %v2115_v44 }
 0x448   :  { %1102 = vmatprep.subr.bf16.mxu0 %v2087_v39  ;;  %1690 = vmatprep.subr.bf16.mxu1 %v2595_v5 }
 0x44b   :  { %1103 = vmatpush1.bf16.msra.mxu0 %v2103_v42  ;;  %1691 = vmatpush3.bf16.msra.mxu1 %v2137_v47 }
 0x44c   :  { %1104 = vmatprep.subr.bf16.mxu0 %v2109_v43  ;;  %1692 = vmatprep.subr.bf16.mxu1 %v2595_v5 }
 0x44f   :  { %1105 = vmatpush1.bf16.msra.mxu0 %v2124_v45  ;;  %1693 = vmatpush3.bf16.msra.mxu1 %v2156_v50 }
 0x450   :  { %1106 = vmatprep.subr.bf16.mxu0 %v2131_v46  ;;  %1694 = vmatprep.subr.bf16.mxu1 %v2595_v5 }
 0x453   :  { %1107 = vmatpush1.bf16.msra.mxu0 %v2144_v48  ;;  %1695 = vmatpush3.bf16.msra.mxu1 %v2171_v52 }
 0x454   :  { %1108 = vmatprep.subr.bf16.mxu0 %v2150_v49  ;;  %1696 = vmatprep.subr.bf16.mxu1 %v2595_v5 }
 0x457   :  { %1109 = vmatpush1.bf16.msra.mxu0 %v2163_v51  ;;  %1697 = vmatpush3.bf16.msra.mxu1 %v2180_v53 }
 0x458   :  { %1199 = vmatprep.subr.bf16.mxu0 %v2016_v25  ;;  %1702 = vmatprep.subr.bf16.mxu1 %v2595_v5 }
 0x50d   :  { %v1023_v14 = vpop.f32.mrb[32].mxu0  ;;  %v1064_v26 = vpop.f32.mrb[24].mxu1 }
 0x50e   :  { %v1070_v24 = vadd.f32 %v1023_v14, %v2245_v41  ;;  %v1025_v1 = vpop.f32.mrb[33].mxu0  ;;  %v1680_v2 = vpop.f32.mrb[25].mxu1  ;;  %v1080_v6 = vadd.f32 %v2268_v15, %v1064_v26 }
 0x50f   :  { %v1075_v55 = vadd.f32 %v1025_v1, %v2249_v57  ;;  %v1027_v35 = vpop.f32.mrb[34].mxu0  ;;  %v1067_v23 = vpop.f32.mrb[26].mxu1 }
 0x510   :  { %v1071_v54 = vmul.f32 0.5, %v1070_v24  ;;  %v1028_v56 = vpop.f32.mrb[35].mxu0  ;;  %v1681_v58 = vpop.f32.mrb[27].mxu1  ;;  %v1867_v23 = vld [vmem:[%s2585_s2 + $0x8] ss:$12 sps:$4 sm:$0xff]  }
 0x511   :  { %v1076_v3 = vmul.f32 0.5, %v1075_v55  ;;  %v1869_v56 = vld [vmem:[%s2585_s2 + $0x18] ss:$12 sps:$4 sm:$0xff]   ;;  %v1870_v58 = vld [vmem:[%s2585_s2 + $0x20] ss:$12 sps:$4 sm:$0xff]  }
 0x512   :  { %1841 = vtanh.f32 %v1071_v54  ;;  %v1868_v54 = vld [vmem:[%s2585_s2 + $0x1c] ss:$12 sps:$4 sm:$0xff]  }
 0x513   :  { %1843 = vtanh.f32 %v1076_v3  ;;  %v1871_v3 = vld [vmem:[%s2585_s2 + $0x34] ss:$12 sps:$4 sm:$0xff]  }
 0x51c   :  { %v1842_v7 = vpop.eup %1841 }
 0x51d   :  { %v1073_v62 = vmul.f32 0.5, %v1842_v7  ;;  %v1844_v12 = vpop.eup %1843  ;;  %v1873_v7 = vld [vmem:[%s2585_s2 + $0x38] ss:$12 sps:$4 sm:$0xff]  }
 0x51e   :  { %v1078_v20 = vmul.f32 0.5, %v1844_v12 }
 0x51f   :  { %v1074_v25 = vadd.f32 0.5, %v1073_v62  ;;  %v1874_v62 = vld [vmem:[%s2585_s2 + $0x4c] ss:$12 sps:$4 sm:$0xff]  }
 0x520   :  { %v1079_v19 = vadd.f32 0.5, %v1078_v20 }
 0x521   :  { %v1081_v61 = vmul.f32 %v1080_v6, %v1074_v25  ;;  %v1875_v25 = vld [vmem:[%s2585_s2 + $0x48] ss:$12 sps:$4 sm:$0xff]   ;;  %v1876_v6 = vld [vmem:[%s2585_s2 + $0x64] ss:$12 sps:$4 sm:$0xff]  }
 0x523   :  { %v1082_v41 = vadd.f32 %v1081_v61, %v2243_v30  ;;  %v1877_v61 = vld [vmem:[%s2585_s2 + $0x60] ss:$12 sps:$4 sm:$0xff]  }
 0x525   :  { %1845 = vtanh.f32 %v1082_v41  ;;  %v1878_v41 = vld [vmem:[%s2585_s2 + $0x7c] ss:$12 sps:$4 sm:$0xff]  }
 0x52f   :  { %v1846_v57 = vpop.eup %1845 }
 0x530   :  { %v1084_v0 = vsub.f32 %v2406_v34, %v1846_v57 }
 0x532   :  { %v1085_v16 = vmul.f32 %v1084_v0, %v1079_v19 }
 0x534   :  { %v2451_v21 = vadd.f32 %v1846_v57, %v1085_v16 }
 0x536   :  { %1088 = vst [vmem:[#allocation4 + $0x20] sm:$0xff] %v2451_v21  ;;  %v1093_v63 = vpack.c.bf16 %v2451_v21, %v2451_v21 }
 0x538   :  { %1127 = vmatmul.mubr.bf16.vlgmr.msra.gmra.mrb[36].mxu0 %v1093_v63  ;;  %1699 = vmatmul.mubr.bf16.vlgmr.msra.gmra.mrb[28].mxu1 %v1093_v63 }
 0x539   :  { %1200 = vmatpush1.bf16.msra.mxu0 %v2024_v27  ;;  %1703 = vmatpush3.bf16.msra.mxu1 %v2051_v32  ;;  %v1865_v27 = vld [vmem:[%s2585_s2 + $0x4] ss:$12 sps:$4 sm:$0xff]  }
 0x53a   :  { %1201 = vmatprep.subr.bf16.mxu0 %v2030_v28  ;;  %1704 = vmatprep.subr.bf16.mxu1 %v2595_v5 }
 0x53b   :  { %1231 = vmatprep.mubr.bf16.mxu0 %v2596_v9  ;;  %1718 = vmatprep.mubr.msk.bf16.mxu1 %vm1905_vm0, %v2595_v5 }
 0x53d   :  { %1202 = vmatpush1.bf16.msra.mxu0 %v2036_v29  ;;  %1705 = vmatpush3.bf16.msra.mxu1 %v2073_v37 }
 0x53e   :  { %1203 = vmatprep.subr.bf16.mxu0 %v2046_v31  ;;  %1706 = vmatprep.subr.bf16.mxu1 %v2595_v5 }
 0x541   :  { %1204 = vmatpush1.bf16.msra.mxu0 %v2056_v33  ;;  %1707 = vmatpush3.bf16.msra.mxu1 %v2093_v40 }
 0x542   :  { %1205 = vmatprep.subr.bf16.mxu0 %v2067_v36  ;;  %1708 = vmatprep.subr.bf16.mxu1 %v2595_v5 }
 0x545   :  { %1206 = vmatpush1.bf16.msra.mxu0 %v2080_v38  ;;  %1709 = vmatpush3.bf16.msra.mxu1 %v2115_v44 }
 0x546   :  { %1207 = vmatprep.subr.bf16.mxu0 %v2087_v39  ;;  %1710 = vmatprep.subr.bf16.mxu1 %v2595_v5 }
 0x549   :  { %1208 = vmatpush1.bf16.msra.mxu0 %v2103_v42  ;;  %1711 = vmatpush3.bf16.msra.mxu1 %v2137_v47 }
 0x54a   :  { %1209 = vmatprep.subr.bf16.mxu0 %v2109_v43  ;;  %1712 = vmatprep.subr.bf16.mxu1 %v2595_v5 }
 0x54d   :  { %1210 = vmatpush1.bf16.msra.mxu0 %v2124_v45  ;;  %1713 = vmatpush3.bf16.msra.mxu1 %v2156_v50 }
 0x54e   :  { %1211 = vmatprep.subr.bf16.mxu0 %v2131_v46  ;;  %1714 = vmatprep.subr.bf16.mxu1 %v2595_v5 }
 0x551   :  { %1212 = vmatpush1.bf16.msra.mxu0 %v2144_v48  ;;  %1715 = vmatpush3.bf16.msra.mxu1 %v2171_v52 }
 0x552   :  { %1213 = vmatprep.subr.bf16.mxu0 %v2150_v49  ;;  %1716 = vmatprep.subr.bf16.mxu1 %v2595_v5 }
 0x555   :  { %1214 = vmatpush1.bf16.msra.mxu0 %v2163_v51  ;;  %1717 = vmatpush3.bf16.msra.mxu1 %v2180_v53 }
 0x556   :  { %1304 = vmatprep.subr.bf16.mxu0 %v1865_v27  ;;  %1722 = vmatprep.subr.bf16.mxu1 %v2595_v5 }
 0x60b   :  { %v1128_v28 = vpop.f32.mrb[36].mxu0  ;;  %v1169_v29 = vpop.f32.mrb[28].mxu1 }
 0x60c   :  { %v1175_v31 = vadd.f32 %v1128_v28, %v2253_v60  ;;  %v1130_v32 = vpop.f32.mrb[37].mxu0  ;;  %v1700_v33 = vpop.f32.mrb[29].mxu1  ;;  %v1185_v34 = vadd.f32 %v2268_v15, %v1169_v29 }
 0x60d   :  { %v1180_v36 = vadd.f32 %v1130_v32, %v2255_v4  ;;  %v1132_v37 = vpop.f32.mrb[38].mxu0  ;;  %v1172_v38 = vpop.f32.mrb[30].mxu1 }
 0x60e   :  { %v1176_v39 = vmul.f32 0.5, %v1175_v31  ;;  %v1133_v40 = vpop.f32.mrb[39].mxu0  ;;  %v1701_v42 = vpop.f32.mrb[31].mxu1 }
 0x60f   :  { %v1181_v43 = vmul.f32 0.5, %v1180_v36 }
 0x610   :  { %1847 = vtanh.f32 %v1176_v39 }
 0x611   :  { %1849 = vtanh.f32 %v1181_v43 }
 0x61a   :  { %v1848_v30 = vpop.eup %1847 }
 0x61b   :  { %v1178_v18 = vmul.f32 0.5, %v1848_v30  ;;  %v1850_v14 = vpop.eup %1849 }
 0x61c   :  { %v1183_v26 = vmul.f32 0.5, %v1850_v14 }
 0x61d   :  { %v1179_v11 = vadd.f32 0.5, %v1178_v18 }
 0x61e   :  { %v1184_v24 = vadd.f32 0.5, %v1183_v26 }
 0x61f   :  { %v1186_v8 = vmul.f32 %v1185_v34, %v1179_v11 }
 0x621   :  { %v1187_v60 = vadd.f32 %v1186_v8, %v2251_v59  ;;  %v1866_v59 = vld [vmem:[%s2585_s2] ss:$12 sps:$4 sm:$0xff]  }
 0x623   :  { %1851 = vtanh.f32 %v1187_v60 }
 0x62d   :  { %v1852_v4 = vpop.eup %1851 }
 0x62e   :  { %v1189_v1 = vsub.f32 %v2451_v21, %v1852_v4  ;;  %v2597_v21 = vld [vmem:[#allocation7_spill] sm:$0xff] }
 0x630   :  { %v1190_v2 = vmul.f32 %v1189_v1, %v1184_v24  ;;  %v2598_v1 = vld [vmem:[#allocation8_spill] sm:$0xff] }
 0x632   :  { %v2498_v55 = vadd.f32 %v1852_v4, %v1190_v2 }
 0x634   :  { %1193 = vst [vmem:[#allocation4 + $0x28] sm:$0xff] %v2498_v55  ;;  %v1198_v35 = vpack.c.bf16 %v2498_v55, %v2498_v55 }
 0x636   :  { %1232 = vmatmul.mubr.bf16.vlgmr.msra.gmra.mrb[40].mxu0 %v1198_v35  ;;  %1719 = vmatmul.mubr.bf16.vlgmr.msra.gmra.mrb[32].mxu1 %v1198_v35 }
 0x637   :  { %1305 = vmatpush1.bf16.msra.mxu0 %v1866_v59  ;;  %1723 = vmatpush3.bf16.msra.mxu1 %v1867_v23 }
 0x638   :  { %1306 = vmatprep.subr.bf16.mxu0 %v1868_v54  ;;  %1724 = vmatprep.subr.bf16.mxu1 %v2595_v5 }
 0x639   :  { %1336 = vmatprep.mubr.bf16.mxu0 %v2596_v9  ;;  %1738 = vmatprep.mubr.msk.bf16.mxu1 %vm1905_vm0, %v2595_v5  ;;  %v1872_v9 = vld [vmem:[%s2585_s2 + $0x30] ss:$12 sps:$4 sm:$0xff]   ;;  %s1907_s2 = smov [#allocation4]  }
 0x63a   :  { %s1410_s21 = sshll.u32 %s1907_s2, 4  ;;  %s1411_s21 = int_to_ptr.vmem [resolvable:$true] %s1410_s21 }
 0x63b   :  { %1307 = vmatpush1.bf16.msra.mxu0 %v1869_v56  ;;  %1725 = vmatpush3.bf16.msra.mxu1 %v1870_v58  ;;  %s1879_s4 = scalar_lea.vmem %s1411_s21, 1024  ;;  %p1884_p1 = scmp.lt.s32.totalorder %s1411_s21, %s1411_s21 }
 0x63c   :  { %1308 = vmatprep.subr.bf16.mxu0 %v1871_v3  ;;  %1726 = vmatprep.subr.bf16.mxu1 %v2595_v5  ;;  %p1880_p0 = scmp.ne.s32.totalorder %s1411_s21, %s1879_s4  ;;  %p1885_p2 = scmp.lt.s32.totalorder %s1879_s4, %s1879_s4 }
 0x63e   :  { %p1886_p3 = por %p1885_p2, %p1884_p1 }
 0x63f   :  { %1309 = vmatpush1.bf16.msra.mxu0 %v1872_v9  ;;  %1727 = vmatpush3.bf16.msra.mxu1 %v1873_v7 }
 0x640   :  { %1310 = vmatprep.subr.bf16.mxu0 %v1874_v62  ;;  %1728 = vmatprep.subr.bf16.mxu1 %v2595_v5  ;;  %p1887_p4 = pnand %p1886_p3, %p1880_p0 }
 0x643   :  { %1311 = vmatpush1.bf16.msra.mxu0 %v1875_v25  ;;  %1729 = vmatpush3.bf16.msra.mxu1 %v2115_v44 }
 0x644   :  { %1312 = vmatprep.subr.bf16.mxu0 %v1876_v6  ;;  %1730 = vmatprep.subr.bf16.mxu1 %v2595_v5 }
 0x647   :  { %1313 = vmatpush1.bf16.msra.mxu0 %v1877_v61  ;;  %1731 = vmatpush3.bf16.msra.mxu1 %v2137_v47 }
 0x648   :  { %1314 = vmatprep.subr.bf16.mxu0 %v1878_v41  ;;  %1732 = vmatprep.subr.bf16.mxu1 %v2595_v5 }
 0x64b   :  { %1315 = vmatpush1.bf16.msra.mxu0 %v2124_v45  ;;  %1733 = vmatpush3.bf16.msra.mxu1 %v2156_v50 }
 0x64c   :  { %1316 = vmatprep.subr.bf16.mxu0 %v2131_v46  ;;  %1734 = vmatprep.subr.bf16.mxu1 %v2595_v5 }
 0x64f   :  { %1317 = vmatpush1.bf16.msra.mxu0 %v2144_v48  ;;  %1735 = vmatpush3.bf16.msra.mxu1 %v2171_v52 }
 0x650   :  { %1318 = vmatprep.subr.bf16.mxu0 %v2150_v49  ;;  %1736 = vmatprep.subr.bf16.mxu1 %v2595_v5 }
 0x653   :  { %1319 = vmatpush1.bf16.msra.mxu0 %v2163_v51  ;;  %1737 = vmatpush3.bf16.msra.mxu1 %v2180_v53 }
 0x709   :  { %v1233_v44 = vpop.f32.mrb[40].mxu0  ;;  %v1274_v45 = vpop.f32.mrb[32].mxu1 }
 0x70a   :  { %v1280_v47 = vadd.f32 %v1233_v44, %v2257_v10  ;;  %v1235_v50 = vpop.f32.mrb[41].mxu0  ;;  %v1720_v46 = vpop.f32.mrb[33].mxu1  ;;  %v1290_v53 = vadd.f32 %v2268_v15, %v1274_v45 }
 0x70b   :  { %v1285_v12 = vadd.f32 %v1235_v50, %v2259_v13  ;;  %v1237_v20 = vpop.f32.mrb[42].mxu0  ;;  %v1277_v48 = vpop.f32.mrb[34].mxu1 }
 0x70c   :  { %v1281_v57 = vmul.f32 0.5, %v1280_v47  ;;  %v1238_v52 = vpop.f32.mrb[43].mxu0  ;;  %v1721_v19 = vpop.f32.mrb[35].mxu1 }
 0x70d   :  { %v1286_v49 = vmul.f32 0.5, %v1285_v12 }
 0x70e   :  { %1853 = vtanh.f32 %v1281_v57 }
 0x70f   :  { %1855 = vtanh.f32 %v1286_v49 }
 0x718   :  { %v1854_v5 = vpop.eup %1853 }
 0x719   :  { %v1283_v0 = vmul.f32 0.5, %v1854_v5  ;;  %v1856_v63 = vpop.eup %1855 }
 0x71a   :  { %v1288_v27 = vmul.f32 0.5, %v1856_v63 }
 0x71b   :  { %v1284_v51 = vadd.f32 0.5, %v1283_v0 }
 0x71c   :  { %v1289_v28 = vadd.f32 0.5, %v1288_v27 }
 0x71d   :  { %v1291_v16 = vmul.f32 %v1290_v53, %v1284_v51 }
 0x71f   :  { %v1292_v10 = vadd.f32 %v1291_v16, %v2597_v21 }
 0x721   :  { %1857 = vtanh.f32 %v1292_v10 }
 0x72b   :  { %v1858_v13 = vpop.eup %1857 }
 0x72c   :  { %v1294_v29 = vsub.f32 %v2498_v55, %v1858_v13 }
 0x72e   :  { %v1295_v31 = vmul.f32 %v1294_v29, %v1289_v28 }
 0x730   :  { %v1296_v32 = vadd.f32 %v1858_v13, %v1295_v31 }
 0x732   :  { %1298 = vst [vmem:[#allocation4 + $0x30] sm:$0xff] %v1296_v32  ;;  %v1303_v33 = vpack.c.bf16 %v1296_v32, %v1296_v32 }
 0x734   :  { %1337 = vmatmul.mubr.bf16.vlgmr.msra.gmra.mrb[44].mxu0 %v1303_v33  ;;  %1739 = vmatmul.mubr.bf16.vlgmr.msra.gmra.mrb[36].mxu1 %v1303_v33 }
 0x807   :  { %v1338_v36 = vpop.f32.mrb[44].mxu0  ;;  %v1379_v37 = vpop.f32.mrb[36].mxu1 }
 0x808   :  { %v1385_v38 = vadd.f32 %v1338_v36, %v2261_v17  ;;  %v1340_v39 = vpop.f32.mrb[45].mxu0  ;;  %v1740_v40 = vpop.f32.mrb[37].mxu1  ;;  %v1395_v4 = vadd.f32 %v2268_v15, %v1379_v37 }
 0x809   :  { %v1390_v42 = vadd.f32 %v1340_v39, %v2263_v22  ;;  %v1342_v43 = vpop.f32.mrb[46].mxu0  ;;  %v1382_v30 = vpop.f32.mrb[38].mxu1 }
 0x80a   :  { %v1386_v18 = vmul.f32 0.5, %v1385_v38  ;;  %v1343_v11 = vpop.f32.mrb[47].mxu0  ;;  %v1741_v34 = vpop.f32.mrb[39].mxu1 }
 0x80b   :  { %v1391_v8 = vmul.f32 0.5, %v1390_v42 }
 0x80c   :  { %1859 = vtanh.f32 %v1386_v18 }
 0x80d   :  { %1861 = vtanh.f32 %v1391_v8 }
 0x816   :  { %v1860_v60 = vpop.eup %1859 }
 0x817   :  { %v1388_v14 = vmul.f32 0.5, %v1860_v60  ;;  %v1862_v2 = vpop.eup %1861 }
 0x818   :  { %v1393_v55 = vmul.f32 0.5, %v1862_v2 }
 0x819   :  { %v1389_v26 = vadd.f32 0.5, %v1388_v14 }
 0x81a   :  { %v1394_v35 = vadd.f32 0.5, %v1393_v55 }
 0x81b   :  { %v1396_v24 = vmul.f32 %v1395_v4, %v1389_v26 }
 0x81d   :  { %v1397_v17 = vadd.f32 %v1396_v24, %v2598_v1 }
 0x81f   :  { %1863 = vtanh.f32 %v1397_v17 }
 0x829   :  { %v1864_v22 = vpop.eup %1863 }
 0x82a   :  { %v1399_v59 = vsub.f32 %v1296_v32, %v1864_v22 }
 0x82c   :  { %v1400_v23 = vmul.f32 %v1399_v59, %v1394_v35 }
 0x82e   :  { %v1401_v54 = vadd.f32 %v1864_v22, %v1400_v23 }
 0x830   :  { %1403 = vst [vmem:[#allocation4 + $0x38] sm:$0xff] %v1401_v54 }
 0x831   :  { %1890 = shalt.err (!%p1887_p4)
}
 0x832   :  { %s1891_s24 = scalar_lea.hbm %s2588_s5, 1024 }
 0x833   :  { %p1892_p5 = scmp.ne.s32.totalorder %s2588_s5, %s1891_s24  ;;  %p1895_p6 = scmp.lt.u32.totalorder %s1891_s24, %s2588_s5 }
 0x835   :  { %p1897_p7 = pnand %p1895_p6, %p1892_p5 }
 0x837   :  { %1900 = shalt.err (!%p1897_p7)
}
 0x838   :  { %s1908_s27 = smov 128   ;;  %s1909_s28 = smov 8  }
 0x839   :  { %1416 = dma.vmem_to_hbm [thread:$0]  %s1411_s21, 1024, %s2588_s5, [#allocation5], %s1908_s27, %s1908_s27, %s1909_s28  }
 0x83a   :  { %1901 = dma.done.wait [#allocation5], 1024  }
 0x83b   :  { %1902 = vsyncadd [#allocation5], 4294966272 }
 0x83c   :  { %1420 = vsyncpa [#allocation5], 1 }

</bundles_post_ra>
